<compile_context>
chip_gen: v7x
topology: tpu7x:2x2x1
jax: 0.10.0
libtpu: 0.0.40
codegen_flags: <defaults>
</compile_context>

<pallas_src>
import math
import jax
import jax.numpy as jnp
from jax.experimental import pallas as pl
from jax.experimental.pallas import tpu as pltpu

# ---- small, module-consistent hyperparameters -------------------------------
NJOINTS = 6
NFEATS = 4
INPUT_FEATS = NJOINTS * NFEATS      # finallayer out features (24)
LATENT_DIM = 32                     # d_model
FF_SIZE = 64                        # dim_feedforward
NUM_LAYERS = 2
NUM_HEADS = 4
HEAD_DIM = LATENT_DIM // NUM_HEADS
NFRAMES = 8
BS = 2
LN_EPS = 1e-5
_LANE = 128
_NEG = -1e9


# ---- in-kernel math helpers (trace-time; all lower inside the Pallas kernel) --
def _layer_norm(x, g, b):
    mu = jnp.mean(x, axis=-1, keepdims=True)
    xc = x - mu
    var = jnp.mean(xc * xc, axis=-1, keepdims=True)
    return xc * jax.lax.rsqrt(var + LN_EPS) * g + b


def _softmax(s):
    s = s - jnp.max(s, axis=-1, keepdims=True)
    e = jnp.exp(s)
    # reciprocal on the EUP slot instead of a VALU divide
    return e * pl.reciprocal(jnp.sum(e, axis=-1, keepdims=True), approx=True)


def _gelu(x):
    # TODO(synk): PyTorch's "gelu" in nn.TransformerDecoderLayer is the exact
    # erf form; tanh approximation used here (max abs deviation ~1e-3).
    c = math.sqrt(2.0 / math.pi)
    return 0.5 * x * (1.0 + jnp.tanh(c * (x + 0.044715 * x * x * x)))


# ---- blob packing: every tensor gets an 8-row-aligned, 128-lane slot ---------
def _pack(entries):
    blocks, off, r = [], {}, 0
    for name, m in entries:
        m = jnp.asarray(m, jnp.float32)
        if m.ndim == 1:
            m = m[None, :]
        h, w = m.shape
        hp = -(-h // 8) * 8
        blk = jnp.zeros((hp, _LANE), jnp.float32).at[:h, :w].set(m)
        blocks.append(blk)
        off[name] = r
        r += hp
    return jnp.concatenate(blocks, axis=0), off


# ---- the Pallas kernel: whole (batch-fused) decoder stack in one invocation ---
def _make_kernel(off, bs, T):
    D, H, Hd = LATENT_DIM, NUM_HEADS, HEAD_DIM
    FF, L = FF_SIZE, NUM_LAYERS
    BT = bs * T
    scale = 1.0 / math.sqrt(Hd)

    def kernel(blob_ref, out_ref):
        def g(name, rows, cols):
            r0 = off[name]
            return blob_ref[r0:r0 + rows, :cols]

        x = g('tq', BT, D)              # (BT, D) positional-encoded time queries
        bias = g('bias', BT, BT)        # block-diag + key-padding additive bias

        for l in range(L):
            # --- self attention (post-norm, like nn.TransformerDecoderLayer) ---
            qkv = (jnp.dot(x, g(f'sa_w{l}', D, 3 * D),
                           preferred_element_type=jnp.float32)
                   + g(f'sa_b{l}', 1, 3 * D))
            q = qkv[:, :D] * scale
            k = qkv[:, D:2 * D]
            v = qkv[:, 2 * D:]
            # (BT, H*D): column block h == v_h @ W_out_h (block-diag weight built
            # in the wrapper) -> heads accumulate directly into projected output.
            vproj = jnp.dot(v, g(f'sa_owb{l}', D, H * D),
                            preferred_element_type=jnp.float32)
            acc = g(f'sa_ob{l}', 1, D)
            for h in range(H):
                sl = slice(h * Hd, (h + 1) * Hd)
                s = jax.lax.dot_general(q[:, sl], k[:, sl],
                                        (((1,), (1,)), ((), ())),
                                        preferred_element_type=jnp.float32)
                p = _softmax(s + bias)
                acc = acc + jnp.dot(p, vproj[:, h * D:(h + 1) * D],
                                    preferred_element_type=jnp.float32)
            x = _layer_norm(x + acc, g(f'n1g{l}', 1, D), g(f'n1b{l}', 1, D))

            # --- cross attention with memory of sequence length 1 ---
            # softmax over a single key is exactly 1, so the block output is
            # out_proj(V(z)); precomputed per (layer, batch) in the wrapper.
            x = _layer_norm(x + g(f'ca{l}', BT, D),
                            g(f'n2g{l}', 1, D), g(f'n2b{l}', 1, D))

            # --- feed-forward block ---
            h1 = (jnp.dot(x, g(f'w1_{l}', D, FF),
                          preferred_element_type=jnp.float32)
                  + g(f'b1_{l}', 1, FF))
            h1 = _gelu(h1)
            ff = (jnp.dot(h1, g(f'w2_{l}', FF, D),
                          preferred_element_type=jnp.float32)
                  + g(f'b2_{l}', 1, D))
            x = _layer_norm(x + ff, g(f'n3g{l}', 1, D), g(f'n3b{l}', 1, D))

        # final linear + zero padded frames (torch: output[~mask.T] = 0).
        # fw/fb/cmask are read full 128-lane wide (zero-padded in the blob), so
        # the kernel writes a lane-dense (BT, 128) slab -> unmasked vst.
        out = (jnp.dot(x, g('fw', D, _LANE), preferred_element_type=jnp.float32)
               + g('fb', 1, _LANE))
        out_ref[...] = out * g('cmask', BT, _LANE)

    return kernel


# ---- wrapper --------------------------------------------------------------
@jax.jit
def decoder_forward(z, mask, params):
    bs, T = mask.shape
    D, F, L, H, Hd = LATENT_DIM, INPUT_FEATS, NUM_LAYERS, NUM_HEADS, HEAD_DIM
    BT = bs * T

    # PositionalEncoding applied to zeros => timequeries == pe[:T]; dropout is a
    # no-op in eval.  Tiled per batch (batch b occupies rows b*T .. (b+1)*T-1).
    pos = jnp.arange(T, dtype=jnp.float32)[:, None]
    div = jnp.exp(jnp.arange(0, D, 2, dtype=jnp.float32) * (-math.log(10000.0) / D))
    pe = jnp.zeros((T, D), jnp.float32)
    pe = pe.at[:, 0::2].set(jnp.sin(pos * div))
    pe = pe.at[:, 1::2].set(jnp.cos(pos * div))
    tq = jnp.tile(pe, (bs, 1))                                    # (BT, D)

    # fused-batch attention bias: block-diagonal (no cross-batch attention) plus
    # key-padding (-1e9 on padded key frames).  exp() of cross terms underflows
    # to exactly 0, so this matches per-batch softmax exactly.
    row_b = jnp.arange(BT) // T
    same_batch = row_b[:, None] == row_b[None, :]
    key_valid = mask.reshape(BT)[None, :]
    bias = jnp.where(same_batch & key_valid, 0.0, _NEG).astype(jnp.float32)

    # output zeroing mask (torch: output[~mask.T] = 0)
    cmask = jnp.broadcast_to(mask.reshape(BT, 1).astype(jnp.float32), (BT, F))

    zf = z.astype(jnp.float32)
    entries = [('tq', tq), ('bias', bias), ('cmask', cmask)]
    for l in range(L):
        # block-diagonal out-projection: (v @ owb)[:, h*D:(h+1)*D] == v_h @ W_out_h
        ow = params['sa_ow'][l]
        owb = jnp.zeros((D, H * D), jnp.float32)
        for h in range(H):
            owb = owb.at[h * Hd:(h + 1) * Hd, h * D:(h + 1) * D].set(
                ow[h * Hd:(h + 1) * Hd, :])

        # cross attention with a single memory token is independent of x:
        # hoist out_proj(V(z)) per (layer, batch) and broadcast over frames.
        vmem = zf @ params['ca_w'][l][:, 2 * D:] + params['ca_b'][l][:, 2 * D:]
        ca = vmem @ params['ca_ow'][l] + params['ca_ob'][l]        # (bs, D)
        ca_bt = jnp.repeat(ca, T, axis=0)                          # (BT, D)

        entries += [
            (f'sa_w{l}', params['sa_w'][l]), (f'sa_b{l}', params['sa_b'][l]),
            (f'sa_owb{l}', owb),             (f'sa_ob{l}', params['sa_ob'][l]),
            (f'w1_{l}', params['w1'][l]),    (f'b1_{l}', params['b1'][l]),
            (f'w2_{l}', params['w2'][l]),    (f'b2_{l}', params['b2'][l]),
            (f'n1g{l}', params['n1g'][l]),   (f'n1b{l}', params['n1b'][l]),
            (f'n2g{l}', params['n2g'][l]),   (f'n2b{l}', params['n2b'][l]),
            (f'n3g{l}', params['n3g'][l]),   (f'n3b{l}', params['n3b'][l]),
            (f'ca{l}', ca_bt),
        ]
    entries += [('fw', params['fw']), ('fb', params['fb'])]

    blob, off = _pack(entries)                 # single (R, 128) f32 input -> one DMA
    kernel = _make_kernel(off, bs, T)

    out128 = pl.pallas_call(
        kernel,
        out_shape=jax.ShapeDtypeStruct((BT, _LANE), jnp.float32),
    )(blob)
    out = out128[:, :F]

    # torch: reshape(T, bs, njoints, nfeats) ... permute(1, 2, 3, 0)
    out = out.reshape(bs, T, NJOINTS, NFEATS)
    return jnp.transpose(out, (0, 2, 3, 1))    # (bs, njoints, nfeats, nframes)


# ---- deterministic synthetic parameters -------------------------------------
def init_params(key):
    L, D, F, FF = NUM_LAYERS, LATENT_DIM, INPUT_FEATS, FF_SIZE
    ks = iter(jax.random.split(key, 16))

    def w(shape, scale=0.08):
        return (scale * jax.random.normal(next(ks), shape)).astype(jnp.float32)

    ones = lambda s: jnp.ones(s, jnp.float32)
    zeros = lambda s: jnp.zeros(s, jnp.float32)

    return {
        # attention / linear weights stored pre-transposed: (in_features, out_features)
        'sa_w': w((L, D, 3 * D)), 'sa_b': w((L, 1, 3 * D), 0.02),
        'sa_ow': w((L, D, D)),    'sa_ob': w((L, 1, D), 0.02),
        'ca_w': w((L, D, 3 * D)), 'ca_b': w((L, 1, 3 * D), 0.02),
        'ca_ow': w((L, D, D)),    'ca_ob': w((L, 1, D), 0.02),
        'w1': w((L, D, FF)),      'b1': w((L, 1, FF), 0.02),
        'w2': w((L, FF, D)),      'b2': w((L, 1, D), 0.02),
        'n1g': ones((L, 1, D)), 'n1b': zeros((L, 1, D)),
        'n2g': ones((L, 1, D)), 'n2b': zeros((L, 1, D)),
        'n3g': ones((L, 1, D)), 'n3b': zeros((L, 1, D)),
        'fw': w((D, F)), 'fb': w((1, F), 0.02),
    }


if __name__ == "__main__":
    key = jax.random.PRNGKey(0)
    kp, kz = jax.random.split(key)
    params = init_params(kp)

    # batch inputs: z (CLIP-style latent), mask / lengths
    z = jax.random.normal(kz, (BS, LATENT_DIM), dtype=jnp.float32)
    lengths = jnp.array([NFRAMES, NFRAMES - 3], dtype=jnp.int32)
    mask = jnp.arange(NFRAMES)[None, :] < lengths[:, None]      # (bs, nframes) bool

    out = decoder_forward(z, mask, params)
    out = jax.block_until_ready(out)

    assert out.shape == (BS, NJOINTS, NFEATS, NFRAMES)
    assert bool(jnp.all(jnp.isfinite(out)))
    # padded frames of batch 1 (frames >= length) must be exactly zero
    assert float(jnp.max(jnp.abs(out[1, :, :, NFRAMES - 3:]))) == 0.0

    print("KERNEL_OK")
</pallas_src>

<mosaic_0001>
module attributes {stable_mosaic.version = 11 : i64} {
  func.func @kernel(%arg0: memref<600x128xf32, #tpu.memory_space<vmem>>, %arg1: memref<16x128xf32, #tpu.memory_space<vmem>>) attributes {dimension_semantics = [], scalar_prefetch = 0 : i64, scratch_operands = 0 : i64, tpu.core_type = #tpu.core_type<tc>} {
    %c0 = arith.constant 0 : index
    %c0_0 = arith.constant 0 : index
    %0 = vector.load %arg0[%c0, %c0_0] : memref<600x128xf32, #tpu.memory_space<vmem>>, vector<16x32xf32>
    %c16 = arith.constant 16 : index
    %c0_1 = arith.constant 0 : index
    %1 = vector.load %arg0[%c16, %c0_1] : memref<600x128xf32, #tpu.memory_space<vmem>>, vector<16x16xf32>
    %c48 = arith.constant 48 : index
    %c0_2 = arith.constant 0 : index
    %2 = vector.load %arg0[%c48, %c0_2] : memref<600x128xf32, #tpu.memory_space<vmem>>, vector<32x96xf32>
    %cst = arith.constant dense<0.000000e+00> : vector<16x96xf32>
    %3 = tpu.matmul %0, %2, %cst {dimension_numbers = #tpu.dot_dimension_numbers<[1], [0], [0], [1], [0, 0, 1, 1], [], []>} : vector<16x32xf32>, vector<32x96xf32>, vector<16x96xf32> -> vector<16x96xf32>
    %c80 = arith.constant 80 : index
    %c0_3 = arith.constant 0 : index
    %4 = vector.load %arg0[%c80, %c0_3] : memref<600x128xf32, #tpu.memory_space<vmem>>, vector<1x96xf32>
    %5 = vector.broadcast %4 : vector<1x96xf32> to vector<16x96xf32>
    %6 = arith.addf %3, %5 : vector<16x96xf32>
    %7 = vector.extract_strided_slice %6 {offsets = [0, 0], sizes = [16, 32], strides = [1, 1]} : vector<16x96xf32> to vector<16x32xf32>
    %cst_4 = arith.constant 0.353553385 : f32
    %8 = vector.broadcast %cst_4 : f32 to vector<16x32xf32>
    %9 = arith.mulf %7, %8 : vector<16x32xf32>
    %10 = vector.extract_strided_slice %6 {offsets = [0, 32], sizes = [16, 32], strides = [1, 1]} : vector<16x96xf32> to vector<16x32xf32>
    %11 = vector.extract_strided_slice %6 {offsets = [0, 64], sizes = [16, 32], strides = [1, 1]} : vector<16x96xf32> to vector<16x32xf32>
    %c88 = arith.constant 88 : index
    %c0_5 = arith.constant 0 : index
    %12 = vector.load %arg0[%c88, %c0_5] : memref<600x128xf32, #tpu.memory_space<vmem>>, vector<32x128xf32>
    %cst_6 = arith.constant dense<0.000000e+00> : vector<16x128xf32>
    %13 = tpu.matmul %11, %12, %cst_6 {dimension_numbers = #tpu.dot_dimension_numbers<[1], [0], [0], [1], [0, 0, 1, 1], [], []>} : vector<16x32xf32>, vector<32x128xf32>, vector<16x128xf32> -> vector<16x128xf32>
    %c120 = arith.constant 120 : index
    %c0_7 = arith.constant 0 : index
    %14 = vector.load %arg0[%c120, %c0_7] : memref<600x128xf32, #tpu.memory_space<vmem>>, vector<1x32xf32>
    %15 = vector.extract_strided_slice %9 {offsets = [0, 0], sizes = [16, 8], strides = [1, 1]} : vector<16x32xf32> to vector<16x8xf32>
    %16 = vector.extract_strided_slice %10 {offsets = [0, 0], sizes = [16, 8], strides = [1, 1]} : vector<16x32xf32> to vector<16x8xf32>
    %cst_8 = arith.constant dense<0.000000e+00> : vector<16x16xf32>
    %17 = tpu.matmul %15, %16, %cst_8 {dimension_numbers = #tpu.dot_dimension_numbers<[1], [1], [0], [0], [0, 0, 1, 0], [], []>} : vector<16x8xf32>, vector<16x8xf32>, vector<16x16xf32> -> vector<16x16xf32>
    %18 = arith.addf %17, %1 : vector<16x16xf32>
    %cst_9 = arith.constant dense<0xFF800000> : vector<16xf32>
    %19 = vector.multi_reduction <maximumf>, %18, %cst_9 [1] : vector<16x16xf32> to vector<16xf32>
    %20 = vector.shape_cast %19 : vector<16xf32> to vector<16x1xf32>
    %21 = vector.broadcast %20 : vector<16x1xf32> to vector<16x16xf32>
    %22 = arith.subf %18, %21 : vector<16x16xf32>
    %23 = math.exp %22 : vector<16x16xf32>
    %cst_10 = arith.constant dense<0.000000e+00> : vector<16xf32>
    %24 = vector.multi_reduction <add>, %23, %cst_10 [1] : vector<16x16xf32> to vector<16xf32>
    %25 = vector.shape_cast %24 : vector<16xf32> to vector<16x1xf32>
    %26 = tpu.reciprocal %25 {approx = true} : vector<16x1xf32> -> vector<16x1xf32>
    %27 = vector.broadcast %26 : vector<16x1xf32> to vector<16x16xf32>
    %28 = arith.mulf %23, %27 : vector<16x16xf32>
    %29 = vector.extract_strided_slice %13 {offsets = [0, 0], sizes = [16, 32], strides = [1, 1]} : vector<16x128xf32> to vector<16x32xf32>
    %cst_11 = arith.constant dense<0.000000e+00> : vector<16x32xf32>
    %30 = tpu.matmul %28, %29, %cst_11 {dimension_numbers = #tpu.dot_dimension_numbers<[1], [0], [0], [1], [0, 0, 1, 1], [], []>} : vector<16x16xf32>, vector<16x32xf32>, vector<16x32xf32> -> vector<16x32xf32>
    %31 = vector.broadcast %14 : vector<1x32xf32> to vector<16x32xf32>
    %32 = arith.addf %31, %30 : vector<16x32xf32>
    %33 = vector.extract_strided_slice %9 {offsets = [0, 8], sizes = [16, 8], strides = [1, 1]} : vector<16x32xf32> to vector<16x8xf32>
    %34 = vector.extract_strided_slice %10 {offsets = [0, 8], sizes = [16, 8], strides = [1, 1]} : vector<16x32xf32> to vector<16x8xf32>
    %cst_12 = arith.constant dense<0.000000e+00> : vector<16x16xf32>
    %35 = tpu.matmul %33, %34, %cst_12 {dimension_numbers = #tpu.dot_dimension_numbers<[1], [1], [0], [0], [0, 0, 1, 0], [], []>} : vector<16x8xf32>, vector<16x8xf32>, vector<16x16xf32> -> vector<16x16xf32>
    %36 = arith.addf %35, %1 : vector<16x16xf32>
    %cst_13 = arith.constant dense<0xFF800000> : vector<16xf32>
    %37 = vector.multi_reduction <maximumf>, %36, %cst_13 [1] : vector<16x16xf32> to vector<16xf32>
    %38 = vector.shape_cast %37 : vector<16xf32> to vector<16x1xf32>
    %39 = vector.broadcast %38 : vector<16x1xf32> to vector<16x16xf32>
    %40 = arith.subf %36, %39 : vector<16x16xf32>
    %41 = math.exp %40 : vector<16x16xf32>
    %cst_14 = arith.constant dense<0.000000e+00> : vector<16xf32>
    %42 = vector.multi_reduction <add>, %41, %cst_14 [1] : vector<16x16xf32> to vector<16xf32>
    %43 = vector.shape_cast %42 : vector<16xf32> to vector<16x1xf32>
    %44 = tpu.reciprocal %43 {approx = true} : vector<16x1xf32> -> vector<16x1xf32>
    %45 = vector.broadcast %44 : vector<16x1xf32> to vector<16x16xf32>
    %46 = arith.mulf %41, %45 : vector<16x16xf32>
    %47 = vector.extract_strided_slice %13 {offsets = [0, 32], sizes = [16, 32], strides = [1, 1]} : vector<16x128xf32> to vector<16x32xf32>
    %cst_15 = arith.constant dense<0.000000e+00> : vector<16x32xf32>
    %48 = tpu.matmul %46, %47, %cst_15 {dimension_numbers = #tpu.dot_dimension_numbers<[1], [0], [0], [1], [0, 0, 1, 1], [], []>} : vector<16x16xf32>, vector<16x32xf32>, vector<16x32xf32> -> vector<16x32xf32>
    %49 = arith.addf %32, %48 : vector<16x32xf32>
    %50 = vector.extract_strided_slice %9 {offsets = [0, 16], sizes = [16, 8], strides = [1, 1]} : vector<16x32xf32> to vector<16x8xf32>
    %51 = vector.extract_strided_slice %10 {offsets = [0, 16], sizes = [16, 8], strides = [1, 1]} : vector<16x32xf32> to vector<16x8xf32>
    %cst_16 = arith.constant dense<0.000000e+00> : vector<16x16xf32>
    %52 = tpu.matmul %50, %51, %cst_16 {dimension_numbers = #tpu.dot_dimension_numbers<[1], [1], [0], [0], [0, 0, 1, 0], [], []>} : vector<16x8xf32>, vector<16x8xf32>, vector<16x16xf32> -> vector<16x16xf32>
    %53 = arith.addf %52, %1 : vector<16x16xf32>
    %cst_17 = arith.constant dense<0xFF800000> : vector<16xf32>
    %54 = vector.multi_reduction <maximumf>, %53, %cst_17 [1] : vector<16x16xf32> to vector<16xf32>
    %55 = vector.shape_cast %54 : vector<16xf32> to vector<16x1xf32>
    %56 = vector.broadcast %55 : vector<16x1xf32> to vector<16x16xf32>
    %57 = arith.subf %53, %56 : vector<16x16xf32>
    %58 = math.exp %57 : vector<16x16xf32>
    %cst_18 = arith.constant dense<0.000000e+00> : vector<16xf32>
    %59 = vector.multi_reduction <add>, %58, %cst_18 [1] : vector<16x16xf32> to vector<16xf32>
    %60 = vector.shape_cast %59 : vector<16xf32> to vector<16x1xf32>
    %61 = tpu.reciprocal %60 {approx = true} : vector<16x1xf32> -> vector<16x1xf32>
    %62 = vector.broadcast %61 : vector<16x1xf32> to vector<16x16xf32>
    %63 = arith.mulf %58, %62 : vector<16x16xf32>
    %64 = vector.extract_strided_slice %13 {offsets = [0, 64], sizes = [16, 32], strides = [1, 1]} : vector<16x128xf32> to vector<16x32xf32>
    %cst_19 = arith.constant dense<0.000000e+00> : vector<16x32xf32>
    %65 = tpu.matmul %63, %64, %cst_19 {dimension_numbers = #tpu.dot_dimension_numbers<[1], [0], [0], [1], [0, 0, 1, 1], [], []>} : vector<16x16xf32>, vector<16x32xf32>, vector<16x32xf32> -> vector<16x32xf32>
    %66 = arith.addf %49, %65 : vector<16x32xf32>
    %67 = vector.extract_strided_slice %9 {offsets = [0, 24], sizes = [16, 8], strides = [1, 1]} : vector<16x32xf32> to vector<16x8xf32>
    %68 = vector.extract_strided_slice %10 {offsets = [0, 24], sizes = [16, 8], strides = [1, 1]} : vector<16x32xf32> to vector<16x8xf32>
    %cst_20 = arith.constant dense<0.000000e+00> : vector<16x16xf32>
    %69 = tpu.matmul %67, %68, %cst_20 {dimension_numbers = #tpu.dot_dimension_numbers<[1], [1], [0], [0], [0, 0, 1, 0], [], []>} : vector<16x8xf32>, vector<16x8xf32>, vector<16x16xf32> -> vector<16x16xf32>
    %70 = arith.addf %69, %1 : vector<16x16xf32>
    %cst_21 = arith.constant dense<0xFF800000> : vector<16xf32>
    %71 = vector.multi_reduction <maximumf>, %70, %cst_21 [1] : vector<16x16xf32> to vector<16xf32>
    %72 = vector.shape_cast %71 : vector<16xf32> to vector<16x1xf32>
    %73 = vector.broadcast %72 : vector<16x1xf32> to vector<16x16xf32>
    %74 = arith.subf %70, %73 : vector<16x16xf32>
    %75 = math.exp %74 : vector<16x16xf32>
    %cst_22 = arith.constant dense<0.000000e+00> : vector<16xf32>
    %76 = vector.multi_reduction <add>, %75, %cst_22 [1] : vector<16x16xf32> to vector<16xf32>
    %77 = vector.shape_cast %76 : vector<16xf32> to vector<16x1xf32>
    %78 = tpu.reciprocal %77 {approx = true} : vector<16x1xf32> -> vector<16x1xf32>
    %79 = vector.broadcast %78 : vector<16x1xf32> to vector<16x16xf32>
    %80 = arith.mulf %75, %79 : vector<16x16xf32>
    %81 = vector.extract_strided_slice %13 {offsets = [0, 96], sizes = [16, 32], strides = [1, 1]} : vector<16x128xf32> to vector<16x32xf32>
    %cst_23 = arith.constant dense<0.000000e+00> : vector<16x32xf32>
    %82 = tpu.matmul %80, %81, %cst_23 {dimension_numbers = #tpu.dot_dimension_numbers<[1], [0], [0], [1], [0, 0, 1, 1], [], []>} : vector<16x16xf32>, vector<16x32xf32>, vector<16x32xf32> -> vector<16x32xf32>
    %83 = arith.addf %66, %82 : vector<16x32xf32>
    %84 = arith.addf %0, %83 : vector<16x32xf32>
    %c240 = arith.constant 240 : index
    %c0_24 = arith.constant 0 : index
    %85 = vector.load %arg0[%c240, %c0_24] : memref<600x128xf32, #tpu.memory_space<vmem>>, vector<1x32xf32>
    %c248 = arith.constant 248 : index
    %c0_25 = arith.constant 0 : index
    %86 = vector.load %arg0[%c248, %c0_25] : memref<600x128xf32, #tpu.memory_space<vmem>>, vector<1x32xf32>
    %cst_26 = arith.constant dense<0.000000e+00> : vector<16xf32>
    %87 = vector.multi_reduction <add>, %84, %cst_26 [1] : vector<16x32xf32> to vector<16xf32>
    %88 = vector.shape_cast %87 : vector<16xf32> to vector<16x1xf32>
    %cst_27 = arith.constant 3.200000e+01 : f32
    %89 = vector.broadcast %cst_27 : f32 to vector<16x1xf32>
    %90 = arith.divf %88, %89 : vector<16x1xf32>
    %91 = vector.broadcast %90 : vector<16x1xf32> to vector<16x32xf32>
    %92 = arith.subf %84, %91 : vector<16x32xf32>
    %93 = arith.mulf %92, %92 : vector<16x32xf32>
    %cst_28 = arith.constant dense<0.000000e+00> : vector<16xf32>
    %94 = vector.multi_reduction <add>, %93, %cst_28 [1] : vector<16x32xf32> to vector<16xf32>
    %95 = vector.shape_cast %94 : vector<16xf32> to vector<16x1xf32>
    %cst_29 = arith.constant 3.200000e+01 : f32
    %96 = vector.broadcast %cst_29 : f32 to vector<16x1xf32>
    %97 = arith.divf %95, %96 : vector<16x1xf32>
    %cst_30 = arith.constant 9.99999974E-6 : f32
    %98 = vector.broadcast %cst_30 : f32 to vector<16x1xf32>
    %99 = arith.addf %97, %98 : vector<16x1xf32>
    %100 = math.rsqrt %99 : vector<16x1xf32>
    %101 = vector.broadcast %100 : vector<16x1xf32> to vector<16x32xf32>
    %102 = arith.mulf %92, %101 : vector<16x32xf32>
    %103 = vector.broadcast %85 : vector<1x32xf32> to vector<16x32xf32>
    %104 = arith.mulf %102, %103 : vector<16x32xf32>
    %105 = vector.broadcast %86 : vector<1x32xf32> to vector<16x32xf32>
    %106 = arith.addf %104, %105 : vector<16x32xf32>
    %c288 = arith.constant 288 : index
    %c0_31 = arith.constant 0 : index
    %107 = vector.load %arg0[%c288, %c0_31] : memref<600x128xf32, #tpu.memory_space<vmem>>, vector<16x32xf32>
    %108 = arith.addf %106, %107 : vector<16x32xf32>
    %c256 = arith.constant 256 : index
    %c0_32 = arith.constant 0 : index
    %109 = vector.load %arg0[%c256, %c0_32] : memref<600x128xf32, #tpu.memory_space<vmem>>, vector<1x32xf32>
    %c264 = arith.constant 264 : index
    %c0_33 = arith.constant 0 : index
    %110 = vector.load %arg0[%c264, %c0_33] : memref<600x128xf32, #tpu.memory_space<vmem>>, vector<1x32xf32>
    %cst_34 = arith.constant dense<0.000000e+00> : vector<16xf32>
    %111 = vector.multi_reduction <add>, %108, %cst_34 [1] : vector<16x32xf32> to vector<16xf32>
    %112 = vector.shape_cast %111 : vector<16xf32> to vector<16x1xf32>
    %cst_35 = arith.constant 3.200000e+01 : f32
    %113 = vector.broadcast %cst_35 : f32 to vector<16x1xf32>
    %114 = arith.divf %112, %113 : vector<16x1xf32>
    %115 = vector.broadcast %114 : vector<16x1xf32> to vector<16x32xf32>
    %116 = arith.subf %108, %115 : vector<16x32xf32>
    %117 = arith.mulf %116, %116 : vector<16x32xf32>
    %cst_36 = arith.constant dense<0.000000e+00> : vector<16xf32>
    %118 = vector.multi_reduction <add>, %117, %cst_36 [1] : vector<16x32xf32> to vector<16xf32>
    %119 = vector.shape_cast %118 : vector<16xf32> to vector<16x1xf32>
    %cst_37 = arith.constant 3.200000e+01 : f32
    %120 = vector.broadcast %cst_37 : f32 to vector<16x1xf32>
    %121 = arith.divf %119, %120 : vector<16x1xf32>
    %cst_38 = arith.constant 9.99999974E-6 : f32
    %122 = vector.broadcast %cst_38 : f32 to vector<16x1xf32>
    %123 = arith.addf %121, %122 : vector<16x1xf32>
    %124 = math.rsqrt %123 : vector<16x1xf32>
    %125 = vector.broadcast %124 : vector<16x1xf32> to vector<16x32xf32>
    %126 = arith.mulf %116, %125 : vector<16x32xf32>
    %127 = vector.broadcast %109 : vector<1x32xf32> to vector<16x32xf32>
    %128 = arith.mulf %126, %127 : vector<16x32xf32>
    %129 = vector.broadcast %110 : vector<1x32xf32> to vector<16x32xf32>
    %130 = arith.addf %128, %129 : vector<16x32xf32>
    %c128 = arith.constant 128 : index
    %c0_39 = arith.constant 0 : index
    %131 = vector.load %arg0[%c128, %c0_39] : memref<600x128xf32, #tpu.memory_space<vmem>>, vector<32x64xf32>
    %cst_40 = arith.constant dense<0.000000e+00> : vector<16x64xf32>
    %132 = tpu.matmul %130, %131, %cst_40 {dimension_numbers = #tpu.dot_dimension_numbers<[1], [0], [0], [1], [0, 0, 1, 1], [], []>} : vector<16x32xf32>, vector<32x64xf32>, vector<16x64xf32> -> vector<16x64xf32>
    %c160 = arith.constant 160 : index
    %c0_41 = arith.constant 0 : index
    %133 = vector.load %arg0[%c160, %c0_41] : memref<600x128xf32, #tpu.memory_space<vmem>>, vector<1x64xf32>
    %134 = vector.broadcast %133 : vector<1x64xf32> to vector<16x64xf32>
    %135 = arith.addf %132, %134 : vector<16x64xf32>
    %cst_42 = arith.constant 5.000000e-01 : f32
    %136 = vector.broadcast %cst_42 : f32 to vector<16x64xf32>
    %137 = arith.mulf %136, %135 : vector<16x64xf32>
    %cst_43 = arith.constant 4.471500e-02 : f32
    %138 = vector.broadcast %cst_43 : f32 to vector<16x64xf32>
    %139 = arith.mulf %138, %135 : vector<16x64xf32>
    %140 = arith.mulf %139, %135 : vector<16x64xf32>
    %141 = arith.mulf %140, %135 : vector<16x64xf32>
    %142 = arith.addf %135, %141 : vector<16x64xf32>
    %cst_44 = arith.constant 0.797884583 : f32
    %143 = vector.broadcast %cst_44 : f32 to vector<16x64xf32>
    %144 = arith.mulf %143, %142 : vector<16x64xf32>
    %145 = math.tanh %144 : vector<16x64xf32>
    %cst_45 = arith.constant 1.000000e+00 : f32
    %146 = vector.broadcast %cst_45 : f32 to vector<16x64xf32>
    %147 = arith.addf %146, %145 : vector<16x64xf32>
    %148 = arith.mulf %137, %147 : vector<16x64xf32>
    %c168 = arith.constant 168 : index
    %c0_46 = arith.constant 0 : index
    %149 = vector.load %arg0[%c168, %c0_46] : memref<600x128xf32, #tpu.memory_space<vmem>>, vector<64x32xf32>
    %cst_47 = arith.constant dense<0.000000e+00> : vector<16x32xf32>
    %150 = tpu.matmul %148, %149, %cst_47 {dimension_numbers = #tpu.dot_dimension_numbers<[1], [0], [0], [1], [0, 0, 1, 1], [], []>} : vector<16x64xf32>, vector<64x32xf32>, vector<16x32xf32> -> vector<16x32xf32>
    %c232 = arith.constant 232 : index
    %c0_48 = arith.constant 0 : index
    %151 = vector.load %arg0[%c232, %c0_48] : memref<600x128xf32, #tpu.memory_space<vmem>>, vector<1x32xf32>
    %152 = vector.broadcast %151 : vector<1x32xf32> to vector<16x32xf32>
    %153 = arith.addf %150, %152 : vector<16x32xf32>
    %154 = arith.addf %130, %153 : vector<16x32xf32>
    %c272 = arith.constant 272 : index
    %c0_49 = arith.constant 0 : index
    %155 = vector.load %arg0[%c272, %c0_49] : memref<600x128xf32, #tpu.memory_space<vmem>>, vector<1x32xf32>
    %c280 = arith.constant 280 : index
    %c0_50 = arith.constant 0 : index
    %156 = vector.load %arg0[%c280, %c0_50] : memref<600x128xf32, #tpu.memory_space<vmem>>, vector<1x32xf32>
    %cst_51 = arith.constant dense<0.000000e+00> : vector<16xf32>
    %157 = vector.multi_reduction <add>, %154, %cst_51 [1] : vector<16x32xf32> to vector<16xf32>
    %158 = vector.shape_cast %157 : vector<16xf32> to vector<16x1xf32>
    %cst_52 = arith.constant 3.200000e+01 : f32
    %159 = vector.broadcast %cst_52 : f32 to vector<16x1xf32>
    %160 = arith.divf %158, %159 : vector<16x1xf32>
    %161 = vector.broadcast %160 : vector<16x1xf32> to vector<16x32xf32>
    %162 = arith.subf %154, %161 : vector<16x32xf32>
    %163 = arith.mulf %162, %162 : vector<16x32xf32>
    %cst_53 = arith.constant dense<0.000000e+00> : vector<16xf32>
    %164 = vector.multi_reduction <add>, %163, %cst_53 [1] : vector<16x32xf32> to vector<16xf32>
    %165 = vector.shape_cast %164 : vector<16xf32> to vector<16x1xf32>
    %cst_54 = arith.constant 3.200000e+01 : f32
    %166 = vector.broadcast %cst_54 : f32 to vector<16x1xf32>
    %167 = arith.divf %165, %166 : vector<16x1xf32>
    %cst_55 = arith.constant 9.99999974E-6 : f32
    %168 = vector.broadcast %cst_55 : f32 to vector<16x1xf32>
    %169 = arith.addf %167, %168 : vector<16x1xf32>
    %170 = math.rsqrt %169 : vector<16x1xf32>
    %171 = vector.broadcast %170 : vector<16x1xf32> to vector<16x32xf32>
    %172 = arith.mulf %162, %171 : vector<16x32xf32>
    %173 = vector.broadcast %155 : vector<1x32xf32> to vector<16x32xf32>
    %174 = arith.mulf %172, %173 : vector<16x32xf32>
    %175 = vector.broadcast %156 : vector<1x32xf32> to vector<16x32xf32>
    %176 = arith.addf %174, %175 : vector<16x32xf32>
    %c304 = arith.constant 304 : index
    %c0_56 = arith.constant 0 : index
    %177 = vector.load %arg0[%c304, %c0_56] : memref<600x128xf32, #tpu.memory_space<vmem>>, vector<32x96xf32>
    %cst_57 = arith.constant dense<0.000000e+00> : vector<16x96xf32>
    %178 = tpu.matmul %176, %177, %cst_57 {dimension_numbers = #tpu.dot_dimension_numbers<[1], [0], [0], [1], [0, 0, 1, 1], [], []>} : vector<16x32xf32>, vector<32x96xf32>, vector<16x96xf32> -> vector<16x96xf32>
    %c336 = arith.constant 336 : index
    %c0_58 = arith.constant 0 : index
    %179 = vector.load %arg0[%c336, %c0_58] : memref<600x128xf32, #tpu.memory_space<vmem>>, vector<1x96xf32>
    %180 = vector.broadcast %179 : vector<1x96xf32> to vector<16x96xf32>
    %181 = arith.addf %178, %180 : vector<16x96xf32>
    %182 = vector.extract_strided_slice %181 {offsets = [0, 0], sizes = [16, 32], strides = [1, 1]} : vector<16x96xf32> to vector<16x32xf32>
    %cst_59 = arith.constant 0.353553385 : f32
    %183 = vector.broadcast %cst_59 : f32 to vector<16x32xf32>
    %184 = arith.mulf %182, %183 : vector<16x32xf32>
    %185 = vector.extract_strided_slice %181 {offsets = [0, 32], sizes = [16, 32], strides = [1, 1]} : vector<16x96xf32> to vector<16x32xf32>
    %186 = vector.extract_strided_slice %181 {offsets = [0, 64], sizes = [16, 32], strides = [1, 1]} : vector<16x96xf32> to vector<16x32xf32>
    %c344 = arith.constant 344 : index
    %c0_60 = arith.constant 0 : index
    %187 = vector.load %arg0[%c344, %c0_60] : memref<600x128xf32, #tpu.memory_space<vmem>>, vector<32x128xf32>
    %cst_61 = arith.constant dense<0.000000e+00> : vector<16x128xf32>
    %188 = tpu.matmul %186, %187, %cst_61 {dimension_numbers = #tpu.dot_dimension_numbers<[1], [0], [0], [1], [0, 0, 1, 1], [], []>} : vector<16x32xf32>, vector<32x128xf32>, vector<16x128xf32> -> vector<16x128xf32>
    %c376 = arith.constant 376 : index
    %c0_62 = arith.constant 0 : index
    %189 = vector.load %arg0[%c376, %c0_62] : memref<600x128xf32, #tpu.memory_space<vmem>>, vector<1x32xf32>
    %190 = vector.extract_strided_slice %184 {offsets = [0, 0], sizes = [16, 8], strides = [1, 1]} : vector<16x32xf32> to vector<16x8xf32>
    %191 = vector.extract_strided_slice %185 {offsets = [0, 0], sizes = [16, 8], strides = [1, 1]} : vector<16x32xf32> to vector<16x8xf32>
    %cst_63 = arith.constant dense<0.000000e+00> : vector<16x16xf32>
    %192 = tpu.matmul %190, %191, %cst_63 {dimension_numbers = #tpu.dot_dimension_numbers<[1], [1], [0], [0], [0, 0, 1, 0], [], []>} : vector<16x8xf32>, vector<16x8xf32>, vector<16x16xf32> -> vector<16x16xf32>
    %193 = arith.addf %192, %1 : vector<16x16xf32>
    %cst_64 = arith.constant dense<0xFF800000> : vector<16xf32>
    %194 = vector.multi_reduction <maximumf>, %193, %cst_64 [1] : vector<16x16xf32> to vector<16xf32>
    %195 = vector.shape_cast %194 : vector<16xf32> to vector<16x1xf32>
    %196 = vector.broadcast %195 : vector<16x1xf32> to vector<16x16xf32>
    %197 = arith.subf %193, %196 : vector<16x16xf32>
    %198 = math.exp %197 : vector<16x16xf32>
    %cst_65 = arith.constant dense<0.000000e+00> : vector<16xf32>
    %199 = vector.multi_reduction <add>, %198, %cst_65 [1] : vector<16x16xf32> to vector<16xf32>
    %200 = vector.shape_cast %199 : vector<16xf32> to vector<16x1xf32>
    %201 = tpu.reciprocal %200 {approx = true} : vector<16x1xf32> -> vector<16x1xf32>
    %202 = vector.broadcast %201 : vector<16x1xf32> to vector<16x16xf32>
    %203 = arith.mulf %198, %202 : vector<16x16xf32>
    %204 = vector.extract_strided_slice %188 {offsets = [0, 0], sizes = [16, 32], strides = [1, 1]} : vector<16x128xf32> to vector<16x32xf32>
    %cst_66 = arith.constant dense<0.000000e+00> : vector<16x32xf32>
    %205 = tpu.matmul %203, %204, %cst_66 {dimension_numbers = #tpu.dot_dimension_numbers<[1], [0], [0], [1], [0, 0, 1, 1], [], []>} : vector<16x16xf32>, vector<16x32xf32>, vector<16x32xf32> -> vector<16x32xf32>
    %206 = vector.broadcast %189 : vector<1x32xf32> to vector<16x32xf32>
    %207 = arith.addf %206, %205 : vector<16x32xf32>
    %208 = vector.extract_strided_slice %184 {offsets = [0, 8], sizes = [16, 8], strides = [1, 1]} : vector<16x32xf32> to vector<16x8xf32>
    %209 = vector.extract_strided_slice %185 {offsets = [0, 8], sizes = [16, 8], strides = [1, 1]} : vector<16x32xf32> to vector<16x8xf32>
    %cst_67 = arith.constant dense<0.000000e+00> : vector<16x16xf32>
    %210 = tpu.matmul %208, %209, %cst_67 {dimension_numbers = #tpu.dot_dimension_numbers<[1], [1], [0], [0], [0, 0, 1, 0], [], []>} : vector<16x8xf32>, vector<16x8xf32>, vector<16x16xf32> -> vector<16x16xf32>
    %211 = arith.addf %210, %1 : vector<16x16xf32>
    %cst_68 = arith.constant dense<0xFF800000> : vector<16xf32>
    %212 = vector.multi_reduction <maximumf>, %211, %cst_68 [1] : vector<16x16xf32> to vector<16xf32>
    %213 = vector.shape_cast %212 : vector<16xf32> to vector<16x1xf32>
    %214 = vector.broadcast %213 : vector<16x1xf32> to vector<16x16xf32>
    %215 = arith.subf %211, %214 : vector<16x16xf32>
    %216 = math.exp %215 : vector<16x16xf32>
    %cst_69 = arith.constant dense<0.000000e+00> : vector<16xf32>
    %217 = vector.multi_reduction <add>, %216, %cst_69 [1] : vector<16x16xf32> to vector<16xf32>
    %218 = vector.shape_cast %217 : vector<16xf32> to vector<16x1xf32>
    %219 = tpu.reciprocal %218 {approx = true} : vector<16x1xf32> -> vector<16x1xf32>
    %220 = vector.broadcast %219 : vector<16x1xf32> to vector<16x16xf32>
    %221 = arith.mulf %216, %220 : vector<16x16xf32>
    %222 = vector.extract_strided_slice %188 {offsets = [0, 32], sizes = [16, 32], strides = [1, 1]} : vector<16x128xf32> to vector<16x32xf32>
    %cst_70 = arith.constant dense<0.000000e+00> : vector<16x32xf32>
    %223 = tpu.matmul %221, %222, %cst_70 {dimension_numbers = #tpu.dot_dimension_numbers<[1], [0], [0], [1], [0, 0, 1, 1], [], []>} : vector<16x16xf32>, vector<16x32xf32>, vector<16x32xf32> -> vector<16x32xf32>
    %224 = arith.addf %207, %223 : vector<16x32xf32>
    %225 = vector.extract_strided_slice %184 {offsets = [0, 16], sizes = [16, 8], strides = [1, 1]} : vector<16x32xf32> to vector<16x8xf32>
    %226 = vector.extract_strided_slice %185 {offsets = [0, 16], sizes = [16, 8], strides = [1, 1]} : vector<16x32xf32> to vector<16x8xf32>
    %cst_71 = arith.constant dense<0.000000e+00> : vector<16x16xf32>
    %227 = tpu.matmul %225, %226, %cst_71 {dimension_numbers = #tpu.dot_dimension_numbers<[1], [1], [0], [0], [0, 0, 1, 0], [], []>} : vector<16x8xf32>, vector<16x8xf32>, vector<16x16xf32> -> vector<16x16xf32>
    %228 = arith.addf %227, %1 : vector<16x16xf32>
    %cst_72 = arith.constant dense<0xFF800000> : vector<16xf32>
    %229 = vector.multi_reduction <maximumf>, %228, %cst_72 [1] : vector<16x16xf32> to vector<16xf32>
    %230 = vector.shape_cast %229 : vector<16xf32> to vector<16x1xf32>
    %231 = vector.broadcast %230 : vector<16x1xf32> to vector<16x16xf32>
    %232 = arith.subf %228, %231 : vector<16x16xf32>
    %233 = math.exp %232 : vector<16x16xf32>
    %cst_73 = arith.constant dense<0.000000e+00> : vector<16xf32>
    %234 = vector.multi_reduction <add>, %233, %cst_73 [1] : vector<16x16xf32> to vector<16xf32>
    %235 = vector.shape_cast %234 : vector<16xf32> to vector<16x1xf32>
    %236 = tpu.reciprocal %235 {approx = true} : vector<16x1xf32> -> vector<16x1xf32>
    %237 = vector.broadcast %236 : vector<16x1xf32> to vector<16x16xf32>
    %238 = arith.mulf %233, %237 : vector<16x16xf32>
    %239 = vector.extract_strided_slice %188 {offsets = [0, 64], sizes = [16, 32], strides = [1, 1]} : vector<16x128xf32> to vector<16x32xf32>
    %cst_74 = arith.constant dense<0.000000e+00> : vector<16x32xf32>
    %240 = tpu.matmul %238, %239, %cst_74 {dimension_numbers = #tpu.dot_dimension_numbers<[1], [0], [0], [1], [0, 0, 1, 1], [], []>} : vector<16x16xf32>, vector<16x32xf32>, vector<16x32xf32> -> vector<16x32xf32>
    %241 = arith.addf %224, %240 : vector<16x32xf32>
    %242 = vector.extract_strided_slice %184 {offsets = [0, 24], sizes = [16, 8], strides = [1, 1]} : vector<16x32xf32> to vector<16x8xf32>
    %243 = vector.extract_strided_slice %185 {offsets = [0, 24], sizes = [16, 8], strides = [1, 1]} : vector<16x32xf32> to vector<16x8xf32>
    %cst_75 = arith.constant dense<0.000000e+00> : vector<16x16xf32>
    %244 = tpu.matmul %242, %243, %cst_75 {dimension_numbers = #tpu.dot_dimension_numbers<[1], [1], [0], [0], [0, 0, 1, 0], [], []>} : vector<16x8xf32>, vector<16x8xf32>, vector<16x16xf32> -> vector<16x16xf32>
    %245 = arith.addf %244, %1 : vector<16x16xf32>
    %cst_76 = arith.constant dense<0xFF800000> : vector<16xf32>
    %246 = vector.multi_reduction <maximumf>, %245, %cst_76 [1] : vector<16x16xf32> to vector<16xf32>
    %247 = vector.shape_cast %246 : vector<16xf32> to vector<16x1xf32>
    %248 = vector.broadcast %247 : vector<16x1xf32> to vector<16x16xf32>
    %249 = arith.subf %245, %248 : vector<16x16xf32>
    %250 = math.exp %249 : vector<16x16xf32>
    %cst_77 = arith.constant dense<0.000000e+00> : vector<16xf32>
    %251 = vector.multi_reduction <add>, %250, %cst_77 [1] : vector<16x16xf32> to vector<16xf32>
    %252 = vector.shape_cast %251 : vector<16xf32> to vector<16x1xf32>
    %253 = tpu.reciprocal %252 {approx = true} : vector<16x1xf32> -> vector<16x1xf32>
    %254 = vector.broadcast %253 : vector<16x1xf32> to vector<16x16xf32>
    %255 = arith.mulf %250, %254 : vector<16x16xf32>
    %256 = vector.extract_strided_slice %188 {offsets = [0, 96], sizes = [16, 32], strides = [1, 1]} : vector<16x128xf32> to vector<16x32xf32>
    %cst_78 = arith.constant dense<0.000000e+00> : vector<16x32xf32>
    %257 = tpu.matmul %255, %256, %cst_78 {dimension_numbers = #tpu.dot_dimension_numbers<[1], [0], [0], [1], [0, 0, 1, 1], [], []>} : vector<16x16xf32>, vector<16x32xf32>, vector<16x32xf32> -> vector<16x32xf32>
    %258 = arith.addf %241, %257 : vector<16x32xf32>
    %259 = arith.addf %176, %258 : vector<16x32xf32>
    %c496 = arith.constant 496 : index
    %c0_79 = arith.constant 0 : index
    %260 = vector.load %arg0[%c496, %c0_79] : memref<600x128xf32, #tpu.memory_space<vmem>>, vector<1x32xf32>
    %c504 = arith.constant 504 : index
    %c0_80 = arith.constant 0 : index
    %261 = vector.load %arg0[%c504, %c0_80] : memref<600x128xf32, #tpu.memory_space<vmem>>, vector<1x32xf32>
    %cst_81 = arith.constant dense<0.000000e+00> : vector<16xf32>
    %262 = vector.multi_reduction <add>, %259, %cst_81 [1] : vector<16x32xf32> to vector<16xf32>
    %263 = vector.shape_cast %262 : vector<16xf32> to vector<16x1xf32>
    %cst_82 = arith.constant 3.200000e+01 : f32
    %264 = vector.broadcast %cst_82 : f32 to vector<16x1xf32>
    %265 = arith.divf %263, %264 : vector<16x1xf32>
    %266 = vector.broadcast %265 : vector<16x1xf32> to vector<16x32xf32>
    %267 = arith.subf %259, %266 : vector<16x32xf32>
    %268 = arith.mulf %267, %267 : vector<16x32xf32>
    %cst_83 = arith.constant dense<0.000000e+00> : vector<16xf32>
    %269 = vector.multi_reduction <add>, %268, %cst_83 [1] : vector<16x32xf32> to vector<16xf32>
    %270 = vector.shape_cast %269 : vector<16xf32> to vector<16x1xf32>
    %cst_84 = arith.constant 3.200000e+01 : f32
    %271 = vector.broadcast %cst_84 : f32 to vector<16x1xf32>
    %272 = arith.divf %270, %271 : vector<16x1xf32>
    %cst_85 = arith.constant 9.99999974E-6 : f32
    %273 = vector.broadcast %cst_85 : f32 to vector<16x1xf32>
    %274 = arith.addf %272, %273 : vector<16x1xf32>
    %275 = math.rsqrt %274 : vector<16x1xf32>
    %276 = vector.broadcast %275 : vector<16x1xf32> to vector<16x32xf32>
    %277 = arith.mulf %267, %276 : vector<16x32xf32>
    %278 = vector.broadcast %260 : vector<1x32xf32> to vector<16x32xf32>
    %279 = arith.mulf %277, %278 : vector<16x32xf32>
    %280 = vector.broadcast %261 : vector<1x32xf32> to vector<16x32xf32>
    %281 = arith.addf %279, %280 : vector<16x32xf32>
    %c544 = arith.constant 544 : index
    %c0_86 = arith.constant 0 : index
    %282 = vector.load %arg0[%c544, %c0_86] : memref<600x128xf32, #tpu.memory_space<vmem>>, vector<16x32xf32>
    %283 = arith.addf %281, %282 : vector<16x32xf32>
    %c512 = arith.constant 512 : index
    %c0_87 = arith.constant 0 : index
    %284 = vector.load %arg0[%c512, %c0_87] : memref<600x128xf32, #tpu.memory_space<vmem>>, vector<1x32xf32>
    %c520 = arith.constant 520 : index
    %c0_88 = arith.constant 0 : index
    %285 = vector.load %arg0[%c520, %c0_88] : memref<600x128xf32, #tpu.memory_space<vmem>>, vector<1x32xf32>
    %cst_89 = arith.constant dense<0.000000e+00> : vector<16xf32>
    %286 = vector.multi_reduction <add>, %283, %cst_89 [1] : vector<16x32xf32> to vector<16xf32>
    %287 = vector.shape_cast %286 : vector<16xf32> to vector<16x1xf32>
    %cst_90 = arith.constant 3.200000e+01 : f32
    %288 = vector.broadcast %cst_90 : f32 to vector<16x1xf32>
    %289 = arith.divf %287, %288 : vector<16x1xf32>
    %290 = vector.broadcast %289 : vector<16x1xf32> to vector<16x32xf32>
    %291 = arith.subf %283, %290 : vector<16x32xf32>
    %292 = arith.mulf %291, %291 : vector<16x32xf32>
    %cst_91 = arith.constant dense<0.000000e+00> : vector<16xf32>
    %293 = vector.multi_reduction <add>, %292, %cst_91 [1] : vector<16x32xf32> to vector<16xf32>
    %294 = vector.shape_cast %293 : vector<16xf32> to vector<16x1xf32>
    %cst_92 = arith.constant 3.200000e+01 : f32
    %295 = vector.broadcast %cst_92 : f32 to vector<16x1xf32>
    %296 = arith.divf %294, %295 : vector<16x1xf32>
    %cst_93 = arith.constant 9.99999974E-6 : f32
    %297 = vector.broadcast %cst_93 : f32 to vector<16x1xf32>
    %298 = arith.addf %296, %297 : vector<16x1xf32>
    %299 = math.rsqrt %298 : vector<16x1xf32>
    %300 = vector.broadcast %299 : vector<16x1xf32> to vector<16x32xf32>
    %301 = arith.mulf %291, %300 : vector<16x32xf32>
    %302 = vector.broadcast %284 : vector<1x32xf32> to vector<16x32xf32>
    %303 = arith.mulf %301, %302 : vector<16x32xf32>
    %304 = vector.broadcast %285 : vector<1x32xf32> to vector<16x32xf32>
    %305 = arith.addf %303, %304 : vector<16x32xf32>
    %c384 = arith.constant 384 : index
    %c0_94 = arith.constant 0 : index
    %306 = vector.load %arg0[%c384, %c0_94] : memref<600x128xf32, #tpu.memory_space<vmem>>, vector<32x64xf32>
    %cst_95 = arith.constant dense<0.000000e+00> : vector<16x64xf32>
    %307 = tpu.matmul %305, %306, %cst_95 {dimension_numbers = #tpu.dot_dimension_numbers<[1], [0], [0], [1], [0, 0, 1, 1], [], []>} : vector<16x32xf32>, vector<32x64xf32>, vector<16x64xf32> -> vector<16x64xf32>
    %c416 = arith.constant 416 : index
    %c0_96 = arith.constant 0 : index
    %308 = vector.load %arg0[%c416, %c0_96] : memref<600x128xf32, #tpu.memory_space<vmem>>, vector<1x64xf32>
    %309 = vector.broadcast %308 : vector<1x64xf32> to vector<16x64xf32>
    %310 = arith.addf %307, %309 : vector<16x64xf32>
    %cst_97 = arith.constant 5.000000e-01 : f32
    %311 = vector.broadcast %cst_97 : f32 to vector<16x64xf32>
    %312 = arith.mulf %311, %310 : vector<16x64xf32>
    %cst_98 = arith.constant 4.471500e-02 : f32
    %313 = vector.broadcast %cst_98 : f32 to vector<16x64xf32>
    %314 = arith.mulf %313, %310 : vector<16x64xf32>
    %315 = arith.mulf %314, %310 : vector<16x64xf32>
    %316 = arith.mulf %315, %310 : vector<16x64xf32>
    %317 = arith.addf %310, %316 : vector<16x64xf32>
    %cst_99 = arith.constant 0.797884583 : f32
    %318 = vector.broadcast %cst_99 : f32 to vector<16x64xf32>
    %319 = arith.mulf %318, %317 : vector<16x64xf32>
    %320 = math.tanh %319 : vector<16x64xf32>
    %cst_100 = arith.constant 1.000000e+00 : f32
    %321 = vector.broadcast %cst_100 : f32 to vector<16x64xf32>
    %322 = arith.addf %321, %320 : vector<16x64xf32>
    %323 = arith.mulf %312, %322 : vector<16x64xf32>
    %c424 = arith.constant 424 : index
    %c0_101 = arith.constant 0 : index
    %324 = vector.load %arg0[%c424, %c0_101] : memref<600x128xf32, #tpu.memory_space<vmem>>, vector<64x32xf32>
    %cst_102 = arith.constant dense<0.000000e+00> : vector<16x32xf32>
    %325 = tpu.matmul %323, %324, %cst_102 {dimension_numbers = #tpu.dot_dimension_numbers<[1], [0], [0], [1], [0, 0, 1, 1], [], []>} : vector<16x64xf32>, vector<64x32xf32>, vector<16x32xf32> -> vector<16x32xf32>
    %c488 = arith.constant 488 : index
    %c0_103 = arith.constant 0 : index
    %326 = vector.load %arg0[%c488, %c0_103] : memref<600x128xf32, #tpu.memory_space<vmem>>, vector<1x32xf32>
    %327 = vector.broadcast %326 : vector<1x32xf32> to vector<16x32xf32>
    %328 = arith.addf %325, %327 : vector<16x32xf32>
    %329 = arith.addf %305, %328 : vector<16x32xf32>
    %c528 = arith.constant 528 : index
    %c0_104 = arith.constant 0 : index
    %330 = vector.load %arg0[%c528, %c0_104] : memref<600x128xf32, #tpu.memory_space<vmem>>, vector<1x32xf32>
    %c536 = arith.constant 536 : index
    %c0_105 = arith.constant 0 : index
    %331 = vector.load %arg0[%c536, %c0_105] : memref<600x128xf32, #tpu.memory_space<vmem>>, vector<1x32xf32>
    %cst_106 = arith.constant dense<0.000000e+00> : vector<16xf32>
    %332 = vector.multi_reduction <add>, %329, %cst_106 [1] : vector<16x32xf32> to vector<16xf32>
    %333 = vector.shape_cast %332 : vector<16xf32> to vector<16x1xf32>
    %cst_107 = arith.constant 3.200000e+01 : f32
    %334 = vector.broadcast %cst_107 : f32 to vector<16x1xf32>
    %335 = arith.divf %333, %334 : vector<16x1xf32>
    %336 = vector.broadcast %335 : vector<16x1xf32> to vector<16x32xf32>
    %337 = arith.subf %329, %336 : vector<16x32xf32>
    %338 = arith.mulf %337, %337 : vector<16x32xf32>
    %cst_108 = arith.constant dense<0.000000e+00> : vector<16xf32>
    %339 = vector.multi_reduction <add>, %338, %cst_108 [1] : vector<16x32xf32> to vector<16xf32>
    %340 = vector.shape_cast %339 : vector<16xf32> to vector<16x1xf32>
    %cst_109 = arith.constant 3.200000e+01 : f32
    %341 = vector.broadcast %cst_109 : f32 to vector<16x1xf32>
    %342 = arith.divf %340, %341 : vector<16x1xf32>
    %cst_110 = arith.constant 9.99999974E-6 : f32
    %343 = vector.broadcast %cst_110 : f32 to vector<16x1xf32>
    %344 = arith.addf %342, %343 : vector<16x1xf32>
    %345 = math.rsqrt %344 : vector<16x1xf32>
    %346 = vector.broadcast %345 : vector<16x1xf32> to vector<16x32xf32>
    %347 = arith.mulf %337, %346 : vector<16x32xf32>
    %348 = vector.broadcast %330 : vector<1x32xf32> to vector<16x32xf32>
    %349 = arith.mulf %347, %348 : vector<16x32xf32>
    %350 = vector.broadcast %331 : vector<1x32xf32> to vector<16x32xf32>
    %351 = arith.addf %349, %350 : vector<16x32xf32>
    %c560 = arith.constant 560 : index
    %c0_111 = arith.constant 0 : index
    %352 = vector.load %arg0[%c560, %c0_111] : memref<600x128xf32, #tpu.memory_space<vmem>>, vector<32x128xf32>
    %cst_112 = arith.constant dense<0.000000e+00> : vector<16x128xf32>
    %353 = tpu.matmul %351, %352, %cst_112 {dimension_numbers = #tpu.dot_dimension_numbers<[1], [0], [0], [1], [0, 0, 1, 1], [], []>} : vector<16x32xf32>, vector<32x128xf32>, vector<16x128xf32> -> vector<16x128xf32>
    %c592 = arith.constant 592 : index
    %c0_113 = arith.constant 0 : index
    %354 = vector.load %arg0[%c592, %c0_113] : memref<600x128xf32, #tpu.memory_space<vmem>>, vector<1x128xf32>
    %355 = vector.broadcast %354 : vector<1x128xf32> to vector<16x128xf32>
    %356 = arith.addf %353, %355 : vector<16x128xf32>
    %c32 = arith.constant 32 : index
    %c0_114 = arith.constant 0 : index
    %357 = vector.load %arg0[%c32, %c0_114] : memref<600x128xf32, #tpu.memory_space<vmem>>, vector<16x128xf32>
    %358 = arith.mulf %356, %357 : vector<16x128xf32>
    %c0_115 = arith.constant 0 : index
    %c0_116 = arith.constant 0 : index
    %359 = vector.load %arg1[%c0_115, %c0_116] : memref<16x128xf32, #tpu.memory_space<vmem>>, vector<16x128xf32>
    tpu.vector_store %arg1[%c0_115, %c0_116], %358 {strides = array<i32>} : memref<16x128xf32, #tpu.memory_space<vmem>>, vector<16x128xf32>,
    return
  }
}

</mosaic_0001>

<bundles_post_ra>
// kernel: decoder_forward.1
= control target key start
LH: loop header
LB: loop body
LE: loop exit
PB: predicated region body
PF: predicated region fallthrough
CT: control target
= control target key end

     0   :  { %vm21_vm0 = vcmask 261120   ;;  %s3554_s28 = smov 64   ;;  %vm199_vm1 = vcmask 64512   ;;  %s3555_s29 = smov 96   ;;  %vm285_vm3 = vcmask 130048   ;;  %vm1211_vm4 = vcmask 523264   ;;  %s4050_s0 = inlined_call_operand.vmem [shape: f32[600,128], index: 0, kind: input, shape index: {}]   ;;  %s4051_s1 = inlined_call_operand.vmem [shape: f32[16,128], index: 1, kind: output, shape index: {}]  }
   0x1   :  { %v12_v0 = vld [vmem:[%s4050_s0 + $0x30] sm:$0xff]  ;;  %v13_v1 = vld [vmem:[%s4050_s0 + $0x38] sm:$0xff]  ;;  %v14_v2 = vld [vmem:[%s4050_s0 + $0x40] sm:$0xff]  ;;  %s3556_s5 = smov 80   ;;  %s3557_s6 = smov 120  }
   0x2   :  { %v3193_v3 = vpack.c.bf16 %v13_v1, %v12_v0  ;;  %v15_v4 = vld [vmem:[%s4050_s0 + $0x48] sm:$0xff]  ;;  %v3588_v5 = vld [vmem:[%s4050_s0] sm:$0xff]  ;;  %v105_v8 = vld [vmem:[%s4050_s0 + $0x58] sm:$0xff]  ;;  %s3558_s7 = smov 88   ;;  %s3559_s8 = smov 72  }
   0x3   :  { %v3197_v6 = vpack.c.bf16 %v15_v4, %v14_v2  ;;  %2974 = vmatprep.mubr.msk.f32.mxu0 %vm21_vm0, %v3588_v5  ;;  %v3595_v7 = vld [vmem:[%s4050_s0 + $0x8] sm:$0xff]  ;;  %v106_v9 = vld [vmem:[%s4050_s0 + $0x60] sm:$0xff]  ;;  %v108_v12 = vld [vmem:[%s4050_s0 + $0x70] sm:$0xff]  ;;  %s3560_s9 = smov 112   ;;  %s3561_s10 = smov 104  }
   0x4   :  { %3194 = vmatprep.subr.bf16.mxu0 %v3193_v3  ;;  %v3201_v10 = vpack.c.bf16 %v106_v9, %v105_v8  ;;  %v107_v11 = vld [vmem:[%s4050_s0 + $0x68] sm:$0xff]  ;;  %v2753_v14 = vld [vmem:[%s4050_s0 + $0x50] ss:$0 sm:$0xff]  ;;  %vm3620_vm2 = vmpackc.low %vm199_vm1, %vm199_vm1  ;;  %s3562_s11 = smov 32  }
   0x5   :  { %3196 = vmatpush3.bf16.msra.mxu0 %v3193_v3  ;;  %v3205_v13 = vpack.c.bf16 %v108_v12, %v107_v11  ;;  %v3636_v33 = vld [vmem:[%s4050_s0 + $0x18] sm:$0xff]  ;;  %v3641_v34 = vld [vmem:[%s4050_s0 + $0x10] sm:$0xff] }
   0x6   :  { %3198 = vmatprep.subr.bf16.mxu0 %v3197_v6  ;;  %3202 = vmatprep.subr.bf16.mxu1 %v3201_v10 }
   0x7   :  { %3204 = vmatpush3.bf16.msra.mxu1 %v3201_v10 }
   0x8   :  { %3206 = vmatprep.subr.bf16.mxu1 %v3205_v13 }
   0x9   :  { %3200 = vmatpush3.bf16.msra.mxu0 %v3197_v6 }
   0xb   :  { %3208 = vmatpush3.bf16.msra.mxu1 %v3205_v13 }
   0xc   :  { %2975 = vmatmul.mubr.msk.f32.vlgmr.msra.gmra.mrb[0].mxu0 %vm21_vm0, %v3595_v7 }
  0xdf   :  { %v2976_v15 = vpop.f32.mrb[0].mxu0 }
  0xe0   :  { %v100_v16 = vadd.f32 %v2976_v15, %v2753_v14  ;;  %v94_v17 = vpop.f32.mrb[1].mxu0 }
  0xe1   :  { %v95_v18 = vadd.f32 %v2753_v14, %v94_v17 }
  0xe2   :  { %113 = vrot.lane.b32.xlu1 %v100_v16, %s3554_s28  ;;  %v104_v28 = vmul.f32 0.35355338, %v100_v16 }
  0xe3   :  { %v3386_v19 = vpack.i.bf16 %v100_v16, %v95_v18  ;;  %v103_v20 = vmul.f32 0.35355338, %v95_v18 }
  0xe5   :  { %3387 = vrot.lane.b32.xlu0 %v3386_v19, %s3555_s29  ;;  %2992 = vmatprep.mubr.msk.f32.mxu0 %vm199_vm1, %v103_v20 }
  0xe9   :  { %111 = vrot.lane.b32.xlu0 %v95_v18, %s3554_s28 }
 0x154   :  { %v114_v27 = vpop.permute.xlu1 %113 }
 0x157   :  { %v3388_v21 = vpop.permute.xlu0 %3387 }
 0x158   :  { %v3390_v22 = vunpack.i.h.bf16 %v3388_v21  ;;  %v3389_v23 = vunpack.i.l.bf16 %v3388_v21 }
 0x15a   :  { %v3209_v25 = vpack.c.bf16 %v3390_v22, %v3389_v23 }
 0x15b   :  { %v112_v26 = vpop.permute.xlu0 %111 }
 0x15c   :  { %2985 = vmatprep.mubr.msk.f32.mxu1 %vm21_vm0, %v112_v26  ;;  %3211 = vmatprep.subr.msk.bf16.mxu0 %vm3620_vm2, %v3209_v25 }
 0x15d   :  { %2986 = vmatmul.mubr.msk.f32.vlgmr.msra.gmra.mrb[0].mxu1 %vm21_vm0, %v114_v27  ;;  %3214 = vmatpush3.bf16.xpose.msk.msra.mxu0 %vm3620_vm2, %v3209_v25 }
 0x164   :  { %2993 = vmatmul.mubr.msk.f32.vlgmr.msra.gmra.mrb[2].mxu0 %vm199_vm1, %v104_v28 }
 0x230   :  { %v2987_v29 = vpop.f32.mrb[0].mxu1 }
 0x231   :  { %v185_v30 = vpop.f32.mrb[1].mxu1 }
 0x232   :  { %v3215_v31 = vpack.c.bf16 %v2987_v29, %v185_v30  ;;  %v3631_v32 = vpack.i.bf16 %v2987_v29, %v185_v30 }
 0x234   :  { %3216 = vmatprep.subr.bf16.mxu1 %v3215_v31 }
 0x235   :  { %3218 = vmatpush3.bf16.msra.mxu1 %v3215_v31 }
 0x237   :  { %v2994_v35 = vpop.f32.mrb[2].mxu0 }
 0x238   :  { %v282_v36 = vadd.f32 %v2994_v35, %v3636_v33  ;;  %v276_v37 = vpop.f32.mrb[3].mxu0 }
 0x239   :  { %v277_v38 = vadd.f32 %v276_v37, %v3641_v34 }
 0x23a   :  { %v289_v39 = vsel %vm285_vm3, %v282_v36, -inf }
 0x23b   :  { %290 = vmax.xlane.f32.xlu0 %v289_v39  ;;  %v286_v40 = vsel %vm285_vm3, %v277_v38, -inf }
 0x23c   :  { %287 = vmax.xlane.f32.xlu1 %v286_v40 }
 0x2c8   :  { %v291_v41 = vpop.xlane.xlu0 %290 }
 0x2c9   :  { %v293_v42 = vsub.f32 %v282_v36, %v291_v41  ;;  %v288_v43 = vpop.xlane.xlu1 %287 }
 0x2ca   :  { %v292_v44 = vsub.f32 %v277_v38, %v288_v43 }
 0x2cb   :  { %v296_v45 = vmul.f32 1.442695, %v293_v42 }
 0x2cc   :  { %v294_v46 = vmul.f32 1.442695, %v292_v44 }
 0x2cd   :  { %3456 = vpow2.f32 %v296_v45 }
 0x2ce   :  { %3458 = vpow2.f32 %v294_v46 }
 0x2d7   :  { %v3457_v47 = vpop.eup %3456 }
 0x2d8   :  { %v3459_v48 = vpop.eup %3458  ;;  %v301_v49 = vsel %vm285_vm3, %v3457_v47, 0.0 }
 0x2d9   :  { %302 = vadd.xlane.f32.xlu1 %v301_v49  ;;  %v298_v50 = vsel %vm285_vm3, %v3459_v48, 0.0 }
 0x2da   :  { %299 = vadd.xlane.f32.xlu0 %v298_v50 }
 0x2ea   :  { %3397 = vrot.lane.b32.xlu1 %v3386_v19, %s3556_s5 }
 0x2ee   :  { %395 = vrot.lane.b32.xlu1 %v103_v20, %s3557_s6 }
 0x2f0   :  { %3392 = vrot.lane.b32.xlu0 %v3386_v19, %s3558_s7 }
 0x2f2   :  { %3402 = vrot.lane.b32.xlu1 %v3386_v19, %s3559_s8 }
 0x2f4   :  { %397 = vrot.lane.b32.xlu0 %v104_v28, %s3557_s6 }
 0x2f6   :  { %601 = vrot.lane.b32.xlu1 %v104_v28, %s3560_s9 }
 0x2f8   :  { %599 = vrot.lane.b32.xlu0 %v103_v20, %s3560_s9 }
 0x2fa   :  { %803 = vrot.lane.b32.xlu1 %v104_v28, %s3561_s10 }
 0x2fc   :  { %801 = vrot.lane.b32.xlu0 %v103_v20, %s3561_s10 }
 0x366   :  { %v303_v51 = vpop.xlane.xlu1 %302 }
 0x367   :  { %3460 = vrcp.f32 %v303_v51  ;;  %v300_v52 = vpop.xlane.xlu0 %299 }
 0x368   :  { %3462 = vrcp.f32 %v300_v52 }
 0x36a   :  { %v3398_v53 = vpop.permute.xlu1 %3397 }
 0x36b   :  { %v3400_v54 = vunpack.i.h.bf16 %v3398_v53  ;;  %v3399_v55 = vunpack.i.l.bf16 %v3398_v53  ;;  %v3393_v56 = vpop.permute.xlu0 %3392 }
 0x36c   :  { %v3395_v57 = vunpack.i.h.bf16 %v3393_v56  ;;  %v3394_v58 = vunpack.i.l.bf16 %v3393_v56 }
 0x36d   :  { %v3229_v59 = vpack.c.bf16 %v3400_v54, %v3399_v55 }
 0x36e   :  { %v3219_v60 = vpack.c.bf16 %v3395_v57, %v3394_v58  ;;  %v396_v61 = vpop.permute.xlu1 %395 }
 0x36f   :  { %v398_v62 = vpop.permute.xlu0 %397  ;;  %3231 = vmatprep.subr.msk.bf16.mxu0 %vm3620_vm2, %v3229_v59 }
 0x370   :  { %3221 = vmatprep.subr.msk.bf16.mxu1 %vm3620_vm2, %v3219_v60  ;;  %3234 = vmatpush3.bf16.xpose.msk.msra.mxu0 %vm3620_vm2, %v3229_v59 }
 0x371   :  { %v3461_v63 = vpop.eup %3460 }
 0x372   :  { %v3463_v0 = vpop.eup %3462  ;;  %v3403_v1 = vpop.permute.xlu1 %3402  ;;  %v307_v8 = vmul.f32 %v3461_v63, %v3457_v47 }
 0x373   :  { %v3405_v2 = vunpack.i.h.bf16 %v3403_v1  ;;  %v3404_v3 = vunpack.i.l.bf16 %v3403_v1  ;;  %v600_v4 = vpop.permute.xlu0 %599  ;;  %v306_v6 = vmul.f32 %v3463_v0, %v3459_v48 }
 0x374   :  { %3020 = vmatprep.mubr.msk.f32.mxu0 %vm199_vm1, %v600_v4 }
 0x375   :  { %v3239_v9 = vpack.c.bf16 %v3405_v2, %v3404_v3  ;;  %2999 = vmatprep.mubr.msk.f32.mxu1 %vm285_vm3, %v306_v6 }
 0x376   :  { %3000 = vmatmul.mubr.msk.f32.vlgmr.msra.gmra.mrb[2].mxu1 %vm285_vm3, %v307_v8  ;;  %v602_v10 = vpop.permute.xlu1 %601 }
 0x377   :  { %3224 = vmatpush3.bf16.xpose.msk.msra.mxu1 %vm3620_vm2, %v3219_v60  ;;  %v802_v11 = vpop.permute.xlu0 %801  ;;  %3006 = vmatprep.mubr.msk.f32.mxu1 %vm199_vm1, %v396_v61 }
 0x378   :  { %3021 = vmatmul.mubr.msk.f32.vlgmr.msra.gmra.mrb[4].mxu0 %vm199_vm1, %v602_v10  ;;  %3241 = vmatprep.subr.msk.bf16.mxu0 %vm3620_vm2, %v3239_v9 }
 0x379   :  { %3244 = vmatpush3.bf16.xpose.msk.msra.mxu0 %vm3620_vm2, %v3239_v9  ;;  %3034 = vmatprep.mubr.msk.f32.mxu0 %vm199_vm1, %v802_v11 }
 0x37a   :  { %v804_v12 = vpop.permute.xlu1 %803 }
 0x37e   :  { %3007 = vmatmul.mubr.msk.f32.vlgmr.msra.gmra.mrb[4].mxu1 %vm199_vm1, %v398_v62 }
 0x380   :  { %3035 = vmatmul.mubr.msk.f32.vlgmr.msra.gmra.mrb[6].mxu0 %vm199_vm1, %v804_v12 }
 0x44b   :  { %v3022_v13 = vpop.f32.mrb[4].mxu0 }
 0x44c   :  { %v681_v14 = vpop.f32.mrb[5].mxu0  ;;  %v687_v27 = vadd.f32 %v3022_v13, %v3636_v33 }
 0x44d   :  { %v682_v22 = vadd.f32 %v681_v14, %v3641_v34 }
 0x44e   :  { %v693_v30 = vsel %vm285_vm3, %v687_v27, -inf }
 0x44f   :  { %v690_v28 = vsel %vm285_vm3, %v682_v22, -inf }
 0x451   :  { %v3008_v15 = vpop.f32.mrb[4].mxu1 }
 0x452   :  { %v483_v16 = vadd.f32 %v3008_v15, %v3636_v33  ;;  %v477_v17 = vpop.f32.mrb[5].mxu1 }
 0x453   :  { %v478_v18 = vadd.f32 %v477_v17, %v3641_v34  ;;  %v3036_v19 = vpop.f32.mrb[6].mxu0 }
 0x454   :  { %v883_v20 = vpop.f32.mrb[7].mxu0  ;;  %v489_v21 = vsel %vm285_vm3, %v483_v16, -inf  ;;  %v889_v29 = vadd.f32 %v3036_v19, %v3636_v33 }
 0x455   :  { %v884_v23 = vadd.f32 %v883_v20, %v3641_v34  ;;  %490 = vmax.xlane.f32.xlu1 %v489_v21  ;;  %v486_v25 = vsel %vm285_vm3, %v478_v18, -inf }
 0x456   :  { %487 = vmax.xlane.f32.xlu0 %v486_v25  ;;  %v895_v31 = vsel %vm285_vm3, %v889_v29, -inf }
 0x457   :  { %v892_v26 = vsel %vm285_vm3, %v884_v23, -inf }
 0x459   :  { %893 = vmax.xlane.f32.xlu1 %v892_v26 }
 0x45a   :  { %691 = vmax.xlane.f32.xlu0 %v690_v28 }
 0x45e   :  { %694 = vmax.xlane.f32.xlu0 %v693_v30 }
 0x462   :  { %896 = vmax.xlane.f32.xlu0 %v895_v31 }
 0x4e2   :  { %v491_v35 = vpop.xlane.xlu1 %490 }
 0x4e3   :  { %v488_v36 = vpop.xlane.xlu0 %487  ;;  %v493_v46 = vsub.f32 %v483_v16, %v491_v35 }
 0x4e4   :  { %v492_v41 = vsub.f32 %v478_v18, %v488_v36  ;;  %v2764_v36 = vld [vmem:[%s4050_s0 + $0x78] ss:$0 sm:$0xff] }
 0x4e5   :  { %v496_v51 = vmul.f32 1.442695, %v493_v46 }
 0x4e6   :  { %v894_v37 = vpop.xlane.xlu1 %893  ;;  %v494_v47 = vmul.f32 1.442695, %v492_v41 }
 0x4e7   :  { %v898_v38 = vsub.f32 %v884_v23, %v894_v37  ;;  %v692_v39 = vpop.xlane.xlu0 %691 }
 0x4e8   :  { %v696_v40 = vsub.f32 %v682_v22, %v692_v39 }
 0x4e9   :  { %v900_v42 = vmul.f32 1.442695, %v898_v38 }
 0x4ea   :  { %v698_v43 = vmul.f32 1.442695, %v696_v40 }
 0x4eb   :  { %v695_v44 = vpop.xlane.xlu0 %694 }
 0x4ec   :  { %3464 = vpow2.f32 %v698_v43  ;;  %v697_v45 = vsub.f32 %v687_v27, %v695_v44 }
 0x4ed   :  { %3466 = vpow2.f32 %v900_v42 }
 0x4ee   :  { %v700_v48 = vmul.f32 1.442695, %v697_v45 }
 0x4ef   :  { %v897_v49 = vpop.xlane.xlu0 %896 }
 0x4f0   :  { %3468 = vpow2.f32 %v700_v48  ;;  %v899_v50 = vsub.f32 %v889_v29, %v897_v49 }
 0x4f1   :  { %3470 = vpow2.f32 %v494_v47 }
 0x4f2   :  { %v902_v52 = vmul.f32 1.442695, %v899_v50 }
 0x4f4   :  { %3472 = vpow2.f32 %v902_v52 }
 0x4f5   :  { %3474 = vpow2.f32 %v496_v51 }
 0x4f6   :  { %v3465_v53 = vpop.eup %3464 }
 0x4f7   :  { %v702_v54 = vsel %vm285_vm3, %v3465_v53, 0.0  ;;  %v3467_v55 = vpop.eup %3466 }
 0x4f8   :  { %703 = vadd.xlane.f32.xlu1 %v702_v54  ;;  %v904_v57 = vsel %vm285_vm3, %v3467_v55, 0.0 }
 0x4fa   :  { %v3469_v56 = vpop.eup %3468 }
 0x4fb   :  { %v705_v58 = vsel %vm285_vm3, %v3469_v56, 0.0  ;;  %v3471_v59 = vpop.eup %3470 }
 0x4fc   :  { %905 = vadd.xlane.f32.xlu1 %v904_v57  ;;  %706 = vadd.xlane.f32.xlu0 %v705_v58  ;;  %v498_v61 = vsel %vm285_vm3, %v3471_v59, 0.0 }
 0x4fe   :  { %v3473_v60 = vpop.eup %3472 }
 0x4ff   :  { %v907_v62 = vsel %vm285_vm3, %v3473_v60, 0.0  ;;  %v3475_v63 = vpop.eup %3474 }
 0x500   :  { %499 = vadd.xlane.f32.xlu1 %v498_v61  ;;  %908 = vadd.xlane.f32.xlu0 %v907_v62  ;;  %v501_v0 = vsel %vm285_vm3, %v3475_v63, 0.0 }
 0x504   :  { %502 = vadd.xlane.f32.xlu0 %v501_v0 }
 0x511   :  { %3407 = vrot.lane.b32.xlu1 %v3631_v32, %s3555_s29 }
 0x515   :  { %3417 = vrot.lane.b32.xlu1 %v3631_v32, %s3562_s11 }
 0x51a   :  { %3412 = vrot.lane.b32.xlu0 %v3631_v32, %s3554_s28 }
 0x585   :  { %v704_v1 = vpop.xlane.xlu1 %703 }
 0x589   :  { %v906_v2 = vpop.xlane.xlu1 %905  ;;  %v707_v3 = vpop.xlane.xlu0 %706 }
 0x58d   :  { %v500_v4 = vpop.xlane.xlu1 %499  ;;  %v909_v6 = vpop.xlane.xlu0 %908 }
 0x58e   :  { %3476 = vrcp.f32 %v500_v4 }
 0x58f   :  { %3478 = vrcp.f32 %v704_v1 }
 0x591   :  { %v3408_v8 = vpop.permute.xlu1 %3407  ;;  %v503_v9 = vpop.xlane.xlu0 %502 }
 0x592   :  { %v3410_v10 = vunpack.i.h.bf16 %v3408_v8  ;;  %v3409_v11 = vunpack.i.l.bf16 %v3408_v8  ;;  %3480 = vrcp.f32 %v503_v9 }
 0x593   :  { %3482 = vrcp.f32 %v707_v3 }
 0x594   :  { %v3225_v12 = vpack.c.bf16 %v3410_v10, %v3409_v11  ;;  %3484 = vrcp.f32 %v906_v2  ;;  %v1047_v2 = vld [vmem:[%s4050_s0 + $0x128] sm:$0xff] }
 0x595   :  { %v3413_v13 = vpop.permute.xlu0 %3412  ;;  %v3418_v32 = vpop.permute.xlu1 %3417  ;;  %3486 = vrcp.f32 %v909_v6  ;;  %v1046_v6 = vld [vmem:[%s4050_s0 + $0x120] sm:$0xff] }
 0x596   :  { %v3415_v14 = vunpack.i.h.bf16 %v3413_v13  ;;  %3226 = vmatprep.subr.bf16.mxu1 %v3225_v12  ;;  %v3414_v15 = vunpack.i.l.bf16 %v3413_v13  ;;  %v3420_v20 = vunpack.i.h.bf16 %v3418_v32  ;;  %v3419_v21 = vunpack.i.l.bf16 %v3418_v32 }
 0x597   :  { %3228 = vmatpush3.bf16.msra.mxu1 %v3225_v12 }
 0x598   :  { %v3477_v16 = vpop.eup %3476  ;;  %v3235_v17 = vpack.c.bf16 %v3415_v14, %v3414_v15  ;;  %v3245_v26 = vpack.c.bf16 %v3420_v20, %v3419_v21 }
 0x599   :  { %v506_v18 = vmul.f32 %v3477_v16, %v3471_v59  ;;  %v3479_v19 = vpop.eup %3478 }
 0x59a   :  { %3236 = vmatprep.subr.bf16.mxu1 %v3235_v17  ;;  %v710_v25 = vmul.f32 %v3479_v19, %v3465_v53 }
 0x59b   :  { %3013 = vmatprep.mubr.msk.f32.mxu1 %vm285_vm3, %v506_v18 }
 0x59c   :  { %v3481_v22 = vpop.eup %3480 }
 0x59d   :  { %v507_v23 = vmul.f32 %v3481_v22, %v3475_v63  ;;  %v3483_v27 = vpop.eup %3482  ;;  %v2784_v63 = vld [vmem:[%s4050_s0 + $0xf8] ss:$0 sm:$0xff]  ;;  %v1090_v22 = vld [vmem:[%s4050_s0 + $0x80] sm:$0xff] }
 0x59e   :  { %v3485_v28 = vpop.eup %3484  ;;  %v711_v29 = vmul.f32 %v3483_v27, %v3469_v56  ;;  %v1093_v27 = vld [vmem:[%s4050_s0 + $0x98] sm:$0xff] }
 0x59f   :  { %3014 = vmatmul.mubr.msk.f32.vlgmr.msra.gmra.mrb[2].mxu1 %vm285_vm3, %v507_v23  ;;  %v912_v30 = vmul.f32 %v3485_v28, %v3467_v55  ;;  %v3487_v31 = vpop.eup %3486  ;;  %v1091_v23 = vld [vmem:[%s4050_s0 + $0x88] sm:$0xff] }
 0x5a0   :  { %3238 = vmatpush3.bf16.msra.mxu1 %v3235_v17  ;;  %3027 = vmatprep.mubr.msk.f32.mxu1 %vm285_vm3, %v710_v25  ;;  %v913_v35 = vmul.f32 %v3487_v31, %v3473_v60  ;;  %v2783_v60 = vld [vmem:[%s4050_s0 + $0xf0] ss:$0 sm:$0xff]  ;;  %v3249_v25 = vpack.c.bf16 %v1091_v23, %v1090_v22 }
 0x5a1   :  { %3246 = vmatprep.subr.bf16.mxu1 %v3245_v26 }
 0x5a2   :  { %3250 = vmatprep.subr.bf16.mxu0 %v3249_v25 }
 0x5a3   :  { %3252 = vmatpush3.bf16.msra.mxu0 %v3249_v25 }
 0x5a7   :  { %3028 = vmatmul.mubr.msk.f32.vlgmr.msra.gmra.mrb[2].mxu1 %vm285_vm3, %v711_v29 }
 0x5a8   :  { %3248 = vmatpush3.bf16.msra.mxu1 %v3245_v26  ;;  %3041 = vmatprep.mubr.msk.f32.mxu1 %vm285_vm3, %v912_v30  ;;  %v1092_v26 = vld [vmem:[%s4050_s0 + $0x90] sm:$0xff] }
 0x5a9   :  { %v3253_v28 = vpack.c.bf16 %v1093_v27, %v1092_v26 }
 0x5ab   :  { %3254 = vmatprep.subr.bf16.mxu0 %v3253_v28 }
 0x5ac   :  { %3256 = vmatpush3.bf16.msra.mxu0 %v3253_v28 }
 0x5af   :  { %3042 = vmatmul.mubr.msk.f32.vlgmr.msra.gmra.mrb[2].mxu1 %vm285_vm3, %v913_v35 }
 0x682   :  { %v3043_v37 = vpop.f32.mrb[2].mxu1 }
 0x683   :  { %v3361_v38 = vadd.f32 %v3043_v37, %v2764_v36  ;;  %v992_v39 = vpop.f32.mrb[3].mxu1 }
 0x684   :  { %v3362_v40 = vadd.f32 %v2764_v36, %v992_v39  ;;  %v2785_v39 = vld [vmem:[%s4050_s0 + $0x100] ss:$0 sm:$0xff] }
 0x685   :  { %v1004_v41 = vadd.f32 %v3361_v38, %v3595_v7 }
 0x686   :  { %v1003_v42 = vadd.f32 %v3362_v40, %v3588_v5 }
 0x687   :  { %v1010_v43 = vsel %vm21_vm0, %v1004_v41, 0.0 }
 0x688   :  { %1011 = vadd.xlane.f32.xlu0 %v1010_v43  ;;  %v1007_v44 = vsel %vm21_vm0, %v1003_v42, 0.0  ;;  %v2786_v43 = vld [vmem:[%s4050_s0 + $0x108] ss:$0 sm:$0xff] }
 0x689   :  { %1008 = vadd.xlane.f32.xlu1 %v1007_v44 }
 0x715   :  { %v1012_v45 = vpop.xlane.xlu0 %1011 }
 0x716   :  { %v1015_v46 = vmul.f32 0.03125, %v1012_v45  ;;  %v1009_v47 = vpop.xlane.xlu1 %1008 }
 0x717   :  { %v1014_v48 = vmul.f32 0.03125, %v1009_v47 }
 0x718   :  { %v1017_v49 = vsub.f32 %v1004_v41, %v1015_v46 }
 0x719   :  { %v1016_v50 = vsub.f32 %v1003_v42, %v1014_v48  ;;  %v1198_v48 = vld [vmem:[%s4050_s0 + $0xa8] sm:$0xff] }
 0x71a   :  { %v1019_v51 = vmul.f32 %v1017_v49, %v1017_v49 }
 0x71b   :  { %v1018_v52 = vmul.f32 %v1016_v50, %v1016_v50 }
 0x71c   :  { %v1023_v53 = vsel %vm21_vm0, %v1019_v51, 0.0  ;;  %v1200_v51 = vld [vmem:[%s4050_s0 + $0xb8] sm:$0xff] }
 0x71d   :  { %1024 = vadd.xlane.f32.xlu1 %v1023_v53  ;;  %v1020_v7 = vsel %vm21_vm0, %v1018_v52, 0.0  ;;  %v1201_v52 = vld [vmem:[%s4050_s0 + $0xc0] sm:$0xff] }
 0x71e   :  { %1021 = vadd.xlane.f32.xlu0 %v1020_v7  ;;  %v3261_v53 = vpack.c.bf16 %v1201_v52, %v1200_v51  ;;  %v1202_v7 = vld [vmem:[%s4050_s0 + $0xc8] sm:$0xff] }
 0x7aa   :  { %v1025_v5 = vpop.xlane.xlu1 %1024 }
 0x7ab   :  { %v1027_v54 = vmul.f32 0.03125, %v1025_v5  ;;  %v1022_v55 = vpop.xlane.xlu0 %1021  ;;  %v1203_v5 = vld [vmem:[%s4050_s0 + $0xd0] sm:$0xff] }
 0x7ac   :  { %v1026_v56 = vmul.f32 0.03125, %v1022_v55  ;;  %v1204_v55 = vld [vmem:[%s4050_s0 + $0xd8] sm:$0xff] }
 0x7ad   :  { %v1029_v57 = vadd.f32 1e-05, %v1027_v54  ;;  %v3265_v54 = vpack.c.bf16 %v1203_v5, %v1202_v7  ;;  %v2793_v7 = vld [vmem:[%s4050_s0 + $0x110] ss:$0 sm:$0xff] }
 0x7ae   :  { %v1028_v58 = vadd.f32 1e-05, %v1026_v56  ;;  %v1205_v56 = vld [vmem:[%s4050_s0 + $0xe0] sm:$0xff] }
 0x7af   :  { %3488 = vrsqrt.f32 %v1029_v57  ;;  %v3269_v57 = vpack.c.bf16 %v1205_v56, %v1204_v55  ;;  %v2794_v56 = vld [vmem:[%s4050_s0 + $0x118] ss:$0 sm:$0xff] }
 0x7b0   :  { %3490 = vrsqrt.f32 %v1028_v58  ;;  %v2787_v58 = vld [vmem:[%s4050_s0 + $0xa0] ss:$0 sm:$0xff] }
 0x7b9   :  { %v3489_v59 = vpop.eup %3488 }
 0x7ba   :  { %v3491_v61 = vpop.eup %3490  ;;  %v1033_v62 = vmul.f32 %v3489_v59, %v1017_v49  ;;  %v1199_v49 = vld [vmem:[%s4050_s0 + $0xb0] sm:$0xff] }
 0x7bb   :  { %v1032_v0 = vmul.f32 %v3491_v61, %v1016_v50  ;;  %v3257_v50 = vpack.c.bf16 %v1199_v49, %v1198_v48 }
 0x7bc   :  { %v1039_v1 = vmul.f32 %v2783_v60, %v1033_v62 }
 0x7bd   :  { %v1038_v3 = vmul.f32 %v2783_v60, %v1032_v0  ;;  %3258 = vmatprep.subr.bf16.mxu1 %v3257_v50 }
 0x7be   :  { %v1045_v4 = vadd.f32 %v2784_v63, %v1039_v1  ;;  %3260 = vmatpush3.bf16.msra.mxu1 %v3257_v50 }
 0x7bf   :  { %v1044_v8 = vadd.f32 %v2784_v63, %v1038_v3  ;;  %3262 = vmatprep.subr.bf16.mxu1 %v3261_v53 }
 0x7c0   :  { %v1049_v9 = vadd.f32 %v1047_v2, %v1045_v4 }
 0x7c1   :  { %v1048_v10 = vadd.f32 %v1046_v6, %v1044_v8 }
 0x7c2   :  { %v1055_v11 = vsel %vm21_vm0, %v1049_v9, 0.0  ;;  %3264 = vmatpush3.bf16.msra.mxu1 %v3261_v53 }
 0x7c3   :  { %1056 = vadd.xlane.f32.xlu1 %v1055_v11  ;;  %v1052_v12 = vsel %vm21_vm0, %v1048_v10, 0.0  ;;  %3266 = vmatprep.subr.bf16.mxu1 %v3265_v54 }
 0x7c4   :  { %1053 = vadd.xlane.f32.xlu0 %v1052_v12 }
 0x7c6   :  { %3268 = vmatpush3.bf16.msra.mxu1 %v3265_v54 }
 0x7c7   :  { %3270 = vmatprep.subr.bf16.mxu1 %v3269_v57 }
 0x7ca   :  { %3272 = vmatpush3.bf16.msra.mxu1 %v3269_v57 }
 0x850   :  { %v1057_v13 = vpop.xlane.xlu1 %1056 }
 0x851   :  { %v1059_v14 = vmul.f32 0.03125, %v1057_v13  ;;  %v1054_v15 = vpop.xlane.xlu0 %1053 }
 0x852   :  { %v1058_v16 = vmul.f32 0.03125, %v1054_v15 }
 0x853   :  { %v1061_v32 = vsub.f32 %v1049_v9, %v1059_v14 }
 0x854   :  { %v1060_v17 = vsub.f32 %v1048_v10, %v1058_v16 }
 0x855   :  { %v1063_v18 = vmul.f32 %v1061_v32, %v1061_v32 }
 0x856   :  { %v1062_v19 = vmul.f32 %v1060_v17, %v1060_v17 }
 0x857   :  { %v1067_v20 = vsel %vm21_vm0, %v1063_v18, 0.0  ;;  %v2790_v18 = vld [vmem:[%s4050_s0 + $0xe8] ss:$0 sm:$0xff] }
 0x858   :  { %1068 = vadd.xlane.f32.xlu1 %v1067_v20  ;;  %v1064_v21 = vsel %vm21_vm0, %v1062_v19, 0.0 }
 0x859   :  { %1065 = vadd.xlane.f32.xlu0 %v1064_v21 }
 0x8e5   :  { %v1069_v29 = vpop.xlane.xlu1 %1068 }
 0x8e6   :  { %v1071_v30 = vmul.f32 0.03125, %v1069_v29  ;;  %v1066_v31 = vpop.xlane.xlu0 %1065 }
 0x8e7   :  { %v1070_v35 = vmul.f32 0.03125, %v1066_v31 }
 0x8e8   :  { %v1073_v36 = vadd.f32 1e-05, %v1071_v30 }
 0x8e9   :  { %v1072_v37 = vadd.f32 1e-05, %v1070_v35 }
 0x8ea   :  { %3492 = vrsqrt.f32 %v1073_v36 }
 0x8eb   :  { %3494 = vrsqrt.f32 %v1072_v37 }
 0x8f4   :  { %v3493_v38 = vpop.eup %3492 }
 0x8f5   :  { %v3495_v40 = vpop.eup %3494  ;;  %v1077_v41 = vmul.f32 %v3493_v38, %v1061_v32 }
 0x8f6   :  { %v1076_v42 = vmul.f32 %v3495_v40, %v1060_v17 }
 0x8f7   :  { %v1083_v44 = vmul.f32 %v2785_v39, %v1077_v41  ;;  %v1335_v41 = vld [vmem:[%s4050_s0 + $0x130] sm:$0xff] }
 0x8f8   :  { %v1082_v45 = vmul.f32 %v2785_v39, %v1076_v42  ;;  %v1336_v42 = vld [vmem:[%s4050_s0 + $0x138] sm:$0xff] }
 0x8f9   :  { %v1089_v47 = vadd.f32 %v2786_v43, %v1083_v44  ;;  %v1337_v44 = vld [vmem:[%s4050_s0 + $0x140] sm:$0xff] }
 0x8fa   :  { %v1088_v46 = vadd.f32 %v2786_v43, %v1082_v45  ;;  %v3273_v43 = vpack.c.bf16 %v1336_v42, %v1335_v41  ;;  %v1338_v45 = vld [vmem:[%s4050_s0 + $0x148] sm:$0xff] }
 0x8fc   :  { %3052 = vmatprep.mubr.msk.f32.mxu0 %vm21_vm0, %v1088_v46  ;;  %3274 = vmatprep.subr.bf16.mxu0 %v3273_v43 }
 0x8fd   :  { %3053 = vmatmul.mubr.msk.f32.vlgmr.msra.gmra.mrb[8].mxu0 %vm21_vm0, %v1089_v47 }
 0x8fe   :  { %3276 = vmatpush3.bf16.msra.mxu0 %v3273_v43 }
 0x9d0   :  { %v3054_v59 = vpop.f32.mrb[8].mxu0 }
 0x9d1   :  { %v1177_v60 = vadd.f32 %v3054_v59, %v2787_v58  ;;  %v1171_v61 = vpop.f32.mrb[9].mxu0 }
 0x9d2   :  { %v1172_v62 = vadd.f32 %v2787_v58, %v1171_v61  ;;  %v1427_v61 = vld [vmem:[%s4050_s0 + $0x158] sm:$0xff] }
 0x9d3   :  { %v1183_v63 = vmul.f32 0.044715, %v1177_v60  ;;  %v1181_v16 = vmul.f32 0.5, %v1177_v60 }
 0x9d4   :  { %v1182_v0 = vmul.f32 0.044715, %v1172_v62  ;;  %v1180_v14 = vmul.f32 0.5, %v1172_v62 }
 0x9d5   :  { %v1185_v1 = vmul.f32 %v1183_v63, %v1177_v60 }
 0x9d6   :  { %v1184_v2 = vmul.f32 %v1182_v0, %v1172_v62  ;;  %v1429_v0 = vld [vmem:[%s4050_s0 + $0x168] sm:$0xff] }
 0x9d7   :  { %v1187_v3 = vmul.f32 %v1185_v1, %v1177_v60  ;;  %v1430_v1 = vld [vmem:[%s4050_s0 + $0x170] sm:$0xff] }
 0x9d8   :  { %v1186_v4 = vmul.f32 %v1184_v2, %v1172_v62  ;;  %v3285_v2 = vpack.c.bf16 %v1430_v1, %v1429_v0 }
 0x9d9   :  { %v1189_v6 = vadd.f32 %v1187_v3, %v1177_v60  ;;  %v2795_v3 = vld [vmem:[%s4050_s0 + $0x150] ss:$0 sm:$0xff] }
 0x9da   :  { %v1188_v8 = vadd.f32 %v1186_v4, %v1172_v62  ;;  %v1428_v62 = vld [vmem:[%s4050_s0 + $0x160] sm:$0xff] }
 0x9db   :  { %v1191_v9 = vmul.f32 0.7978846, %v1189_v6  ;;  %v3281_v63 = vpack.c.bf16 %v1428_v62, %v1427_v61 }
 0x9dc   :  { %v1190_v10 = vmul.f32 0.7978846, %v1188_v8 }
 0x9dd   :  { %3496 = vtanh.f32 %v1191_v9 }
 0x9de   :  { %3498 = vtanh.f32 %v1190_v10 }
 0x9e7   :  { %v3497_v11 = vpop.eup %3496 }
 0x9e8   :  { %v3499_v12 = vpop.eup %3498  ;;  %v1195_v13 = vadd.f32 1.0, %v3497_v11 }
 0x9e9   :  { %v1194_v15 = vadd.f32 1.0, %v3499_v12 }
 0x9ea   :  { %v1197_v17 = vmul.f32 %v1195_v13, %v1181_v16 }
 0x9eb   :  { %v1196_v32 = vmul.f32 %v1194_v15, %v1180_v14 }
 0x9ed   :  { %3071 = vmatprep.mubr.msk.f32.mxu1 %vm1211_vm4, %v1196_v32 }
 0x9ee   :  { %3072 = vmatmul.mubr.msk.f32.vlgmr.msra.gmra.mrb[6].mxu1 %vm1211_vm4, %v1197_v17 }
 0xac1   :  { %v3073_v19 = vpop.f32.mrb[6].mxu1 }
 0xac2   :  { %v1290_v20 = vadd.f32 %v3073_v19, %v2790_v18  ;;  %v1284_v21 = vpop.f32.mrb[7].mxu1 }
 0xac3   :  { %v1285_v22 = vadd.f32 %v2790_v18, %v1284_v21 }
 0xac4   :  { %v1294_v23 = vadd.f32 %v1290_v20, %v1089_v47 }
 0xac5   :  { %v1293_v25 = vadd.f32 %v1285_v22, %v1088_v46  ;;  %v3277_v46 = vpack.c.bf16 %v1338_v45, %v1337_v44 }
 0xac6   :  { %v1300_v26 = vsel %vm21_vm0, %v1294_v23, 0.0 }
 0xac7   :  { %1301 = vadd.xlane.f32.xlu1 %v1300_v26  ;;  %v1297_v27 = vsel %vm21_vm0, %v1293_v25, 0.0  ;;  %3278 = vmatprep.subr.bf16.mxu0 %v3277_v46 }
 0xac8   :  { %1298 = vadd.xlane.f32.xlu0 %v1297_v27  ;;  %3280 = vmatpush3.bf16.msra.mxu0 %v3277_v46 }
 0xac9   :  { %3282 = vmatprep.subr.bf16.mxu0 %v3281_v63 }
 0xb54   :  { %v1302_v28 = vpop.xlane.xlu1 %1301 }
 0xb55   :  { %v1304_v29 = vmul.f32 0.03125, %v1302_v28  ;;  %v1299_v30 = vpop.xlane.xlu0 %1298 }
 0xb56   :  { %v1303_v31 = vmul.f32 0.03125, %v1299_v30 }
 0xb57   :  { %v1306_v35 = vsub.f32 %v1294_v23, %v1304_v29 }
 0xb58   :  { %v1305_v36 = vsub.f32 %v1293_v25, %v1303_v31 }
 0xb59   :  { %v1308_v37 = vmul.f32 %v1306_v35, %v1306_v35 }
 0xb5a   :  { %v1307_v38 = vmul.f32 %v1305_v36, %v1305_v36 }
 0xb5b   :  { %v1312_v39 = vsel %vm21_vm0, %v1308_v37, 0.0 }
 0xb5c   :  { %1313 = vadd.xlane.f32.xlu1 %v1312_v39  ;;  %v1309_v40 = vsel %vm21_vm0, %v1307_v38, 0.0 }
 0xb5d   :  { %1310 = vadd.xlane.f32.xlu0 %v1309_v40 }
 0xbe9   :  { %v1314_v47 = vpop.xlane.xlu1 %1313 }
 0xbea   :  { %v1316_v48 = vmul.f32 0.03125, %v1314_v47  ;;  %v1311_v49 = vpop.xlane.xlu0 %1310 }
 0xbeb   :  { %v1315_v50 = vmul.f32 0.03125, %v1311_v49 }
 0xbec   :  { %v1318_v51 = vadd.f32 1e-05, %v1316_v48 }
 0xbed   :  { %v1317_v52 = vadd.f32 1e-05, %v1315_v50 }
 0xbee   :  { %3500 = vrsqrt.f32 %v1318_v51 }
 0xbef   :  { %3502 = vrsqrt.f32 %v1317_v52 }
 0xbf8   :  { %v3501_v53 = vpop.eup %3500 }
 0xbf9   :  { %v3503_v5 = vpop.eup %3502  ;;  %v1322_v54 = vmul.f32 %v3501_v53, %v1306_v35 }
 0xbfa   :  { %v1321_v55 = vmul.f32 %v3503_v5, %v1305_v36 }
 0xbfb   :  { %v1328_v57 = vmul.f32 %v2793_v7, %v1322_v54 }
 0xbfc   :  { %v1327_v58 = vmul.f32 %v2793_v7, %v1321_v55 }
 0xbfd   :  { %v3809_v60 = vadd.f32 %v2794_v56, %v1328_v57 }
 0xbfe   :  { %v3807_v59 = vadd.f32 %v2794_v56, %v1327_v58 }
 0xc00   :  { %3082 = vmatprep.mubr.msk.f32.mxu0 %vm21_vm0, %v3807_v59 }
 0xc01   :  { %3083 = vmatmul.mubr.msk.f32.vlgmr.msra.gmra.mrb[10].mxu0 %vm21_vm0, %v3809_v60 }
 0xc02   :  { %3284 = vmatpush3.bf16.msra.mxu0 %v3281_v63 }
 0xc03   :  { %3286 = vmatprep.subr.bf16.mxu0 %v3285_v2 }
 0xc06   :  { %3288 = vmatpush3.bf16.msra.mxu0 %v3285_v2 }
 0xcd4   :  { %v3084_v4 = vpop.f32.mrb[10].mxu0 }
 0xcd5   :  { %v1422_v6 = vadd.f32 %v3084_v4, %v2795_v3  ;;  %v1416_v8 = vpop.f32.mrb[11].mxu0 }
 0xcd6   :  { %v1417_v9 = vadd.f32 %v2795_v3, %v1416_v8 }
 0xcd7   :  { %v3846_v17 = vmul.f32 0.35355338, %v1422_v6 }
 0xcd8   :  { %1433 = vrot.lane.b32.xlu1 %v1417_v9, %s3554_s28  ;;  %v3831_v10 = vpack.i.bf16 %v1422_v6, %v1417_v9  ;;  %v3833_v11 = vmul.f32 0.35355338, %v1417_v9 }
 0xcda   :  { %3422 = vrot.lane.b32.xlu0 %v3831_v10, %s3555_s29  ;;  %3100 = vmatprep.mubr.msk.f32.mxu1 %vm199_vm1, %v3833_v11 }
 0xcdc   :  { %1435 = vrot.lane.b32.xlu1 %v1422_v6, %s3554_s28 }
 0xd4a   :  { %v1434_v12 = vpop.permute.xlu1 %1433 }
 0xd4b   :  { %3093 = vmatprep.mubr.msk.f32.mxu0 %vm21_vm0, %v1434_v12 }
 0xd4c   :  { %v3423_v13 = vpop.permute.xlu0 %3422 }
 0xd4d   :  { %v3425_v14 = vunpack.i.h.bf16 %v3423_v13  ;;  %v3424_v15 = vunpack.i.l.bf16 %v3423_v13 }
 0xd4e   :  { %v1436_v16 = vpop.permute.xlu1 %1435 }
 0xd4f   :  { %v3289_v32 = vpack.c.bf16 %v3425_v14, %v3424_v15  ;;  %3094 = vmatmul.mubr.msk.f32.vlgmr.msra.gmra.mrb[12].mxu0 %vm21_vm0, %v1436_v16 }
 0xd51   :  { %3291 = vmatprep.subr.msk.bf16.mxu1 %vm3620_vm2, %v3289_v32 }
 0xd52   :  { %3294 = vmatpush3.bf16.xpose.msk.msra.mxu1 %vm3620_vm2, %v3289_v32 }
 0xd59   :  { %3101 = vmatmul.mubr.msk.f32.vlgmr.msra.gmra.mrb[8].mxu1 %vm199_vm1, %v3846_v17 }
 0xe22   :  { %v3095_v18 = vpop.f32.mrb[12].mxu0 }
 0xe23   :  { %v1507_v19 = vpop.f32.mrb[13].mxu0 }
 0xe24   :  { %v3295_v20 = vpack.c.bf16 %v3095_v18, %v1507_v19  ;;  %v3850_v21 = vpack.i.bf16 %v3095_v18, %v1507_v19 }
 0xe26   :  { %3296 = vmatprep.subr.bf16.mxu1 %v3295_v20 }
 0xe27   :  { %3298 = vmatpush3.bf16.msra.mxu1 %v3295_v20 }
 0xe2c   :  { %v3102_v22 = vpop.f32.mrb[8].mxu1 }
 0xe2d   :  { %v1603_v23 = vadd.f32 %v3102_v22, %v3636_v33  ;;  %v1597_v25 = vpop.f32.mrb[9].mxu1 }
 0xe2e   :  { %v1598_v26 = vadd.f32 %v1597_v25, %v3641_v34 }
 0xe2f   :  { %v1609_v27 = vsel %vm285_vm3, %v1603_v23, -inf }
 0xe30   :  { %1610 = vmax.xlane.f32.xlu1 %v1609_v27  ;;  %v1606_v28 = vsel %vm285_vm3, %v1598_v26, -inf }
 0xe31   :  { %1607 = vmax.xlane.f32.xlu0 %v1606_v28 }
 0xe41   :  { %3427 = vrot.lane.b32.xlu1 %v3831_v10, %s3558_s7 }
 0xe45   :  { %1717 = vrot.lane.b32.xlu1 %v3846_v17, %s3557_s6 }
 0xebd   :  { %v1611_v29 = vpop.xlane.xlu1 %1610 }
 0xebe   :  { %v1613_v30 = vsub.f32 %v1603_v23, %v1611_v29  ;;  %v1608_v31 = vpop.xlane.xlu0 %1607 }
 0xebf   :  { %v1612_v35 = vsub.f32 %v1598_v26, %v1608_v31 }
 0xec0   :  { %v1616_v36 = vmul.f32 1.442695, %v1613_v30 }
 0xec1   :  { %v1614_v37 = vmul.f32 1.442695, %v1612_v35  ;;  %v3428_v38 = vpop.permute.xlu1 %3427 }
 0xec2   :  { %v3430_v39 = vunpack.i.h.bf16 %v3428_v38  ;;  %v3429_v40 = vunpack.i.l.bf16 %v3428_v38 }
 0xec3   :  { %3504 = vpow2.f32 %v1614_v37  ;;  %v3552_v37 = vld [vmem:[%s4050_s0 + $0x18] sm:$0xff] }
 0xec4   :  { %v3299_v41 = vpack.c.bf16 %v3430_v39, %v3429_v40  ;;  %3506 = vpow2.f32 %v1616_v36  ;;  %v3553_v40 = vld [vmem:[%s4050_s0 + $0x10] sm:$0xff] }
 0xec5   :  { %v1718_v53 = vpop.permute.xlu1 %1717 }
 0xec6   :  { %3301 = vmatprep.subr.msk.bf16.mxu1 %vm3620_vm2, %v3299_v41 }
 0xecd   :  { %v3505_v42 = vpop.eup %3504 }
 0xece   :  { %v1618_v43 = vsel %vm285_vm3, %v3505_v42, 0.0  ;;  %v3507_v44 = vpop.eup %3506 }
 0xecf   :  { %1619 = vadd.xlane.f32.xlu0 %v1618_v43  ;;  %v1621_v45 = vsel %vm285_vm3, %v3507_v44, 0.0 }
 0xed3   :  { %1622 = vadd.xlane.f32.xlu0 %v1621_v45 }
 0xee9   :  { %1715 = vrot.lane.b32.xlu0 %v3833_v11, %s3557_s6 }
 0xf5c   :  { %v1620_v46 = vpop.xlane.xlu0 %1619 }
 0xf5d   :  { %3508 = vrcp.f32 %v1620_v46 }
 0xf60   :  { %v1623_v47 = vpop.xlane.xlu0 %1622 }
 0xf61   :  { %3510 = vrcp.f32 %v1623_v47 }
 0xf64   :  { %v1716_v52 = vpop.permute.xlu0 %1715 }
 0xf67   :  { %v3509_v48 = vpop.eup %3508 }
 0xf68   :  { %v1626_v49 = vmul.f32 %v3509_v48, %v3505_v42 }
 0xf6a   :  { %3107 = vmatprep.mubr.msk.f32.mxu1 %vm285_vm3, %v1626_v49 }
 0xf6b   :  { %v3511_v50 = vpop.eup %3510 }
 0xf6c   :  { %v1627_v51 = vmul.f32 %v3511_v50, %v3507_v44 }
 0xf6e   :  { %3108 = vmatmul.mubr.msk.f32.vlgmr.msra.gmra.mrb[10].mxu1 %vm285_vm3, %v1627_v51 }
 0xf6f   :  { %3304 = vmatpush3.bf16.xpose.msk.msra.mxu1 %vm3620_vm2, %v3299_v41  ;;  %3114 = vmatprep.mubr.msk.f32.mxu1 %vm199_vm1, %v1716_v52 }
 0xf76   :  { %3115 = vmatmul.mubr.msk.f32.vlgmr.msra.gmra.mrb[12].mxu1 %vm199_vm1, %v1718_v53 }
0x1041   :  { %v3872_v7 = vpop.f32.mrb[10].mxu1 }
0x1042   :  { %v3874_v5 = vpop.f32.mrb[11].mxu1 }
0x1049   :  { %v3116_v54 = vpop.f32.mrb[12].mxu1 }
0x104a   :  { %v1803_v55 = vadd.f32 %v3116_v54, %v3636_v33  ;;  %v1797_v56 = vpop.f32.mrb[13].mxu1 }
0x104b   :  { %v1798_v57 = vadd.f32 %v1797_v56, %v3641_v34 }
0x104c   :  { %v1809_v58 = vsel %vm285_vm3, %v1803_v55, -inf }
0x104d   :  { %1810 = vmax.xlane.f32.xlu0 %v1809_v58  ;;  %v1806_v61 = vsel %vm285_vm3, %v1798_v57, -inf }
0x104e   :  { %1807 = vmax.xlane.f32.xlu1 %v1806_v61 }
0x10da   :  { %v1811_v62 = vpop.xlane.xlu0 %1810 }
0x10db   :  { %v1813_v63 = vsub.f32 %v1803_v55, %v1811_v62  ;;  %v1808_v0 = vpop.xlane.xlu1 %1807 }
0x10dc   :  { %v1812_v1 = vsub.f32 %v1798_v57, %v1808_v0 }
0x10dd   :  { %v1816_v2 = vmul.f32 1.442695, %v1813_v63 }
0x10de   :  { %v1814_v3 = vmul.f32 1.442695, %v1812_v1 }
0x10df   :  { %3512 = vpow2.f32 %v1816_v2 }
0x10e0   :  { %3514 = vpow2.f32 %v1814_v3 }
0x10e9   :  { %v3513_v4 = vpop.eup %3512 }
0x10ea   :  { %v3515_v6 = vpop.eup %3514  ;;  %v1821_v33 = vsel %vm285_vm3, %v3513_v4, 0.0 }
0x10eb   :  { %1822 = vadd.xlane.f32.xlu1 %v1821_v33  ;;  %v1818_v34 = vsel %vm285_vm3, %v3515_v6, 0.0 }
0x10ec   :  { %1819 = vadd.xlane.f32.xlu0 %v1818_v34 }
0x10fc   :  { %3437 = vrot.lane.b32.xlu1 %v3831_v10, %s3556_s5 }
0x1100   :  { %3442 = vrot.lane.b32.xlu1 %v3831_v10, %s3559_s8 }
0x1102   :  { %3432 = vrot.lane.b32.xlu0 %v3850_v21, %s3555_s29 }
0x1104   :  { %1921 = vrot.lane.b32.xlu1 %v3846_v17, %s3560_s9 }
0x1106   :  { %1919 = vrot.lane.b32.xlu0 %v3833_v11, %s3560_s9 }
0x1108   :  { %2123 = vrot.lane.b32.xlu1 %v3846_v17, %s3561_s10 }
0x110a   :  { %2121 = vrot.lane.b32.xlu0 %v3833_v11, %s3561_s10 }
0x1178   :  { %v1823_v8 = vpop.xlane.xlu1 %1822 }
0x1179   :  { %3516 = vrcp.f32 %v1823_v8  ;;  %v1820_v9 = vpop.xlane.xlu0 %1819 }
0x117a   :  { %3518 = vrcp.f32 %v1820_v9 }
0x117c   :  { %v3438_v10 = vpop.permute.xlu1 %3437 }
0x117d   :  { %v3433_v12 = vpop.permute.xlu0 %3432  ;;  %v3440_v13 = vunpack.i.h.bf16 %v3438_v10  ;;  %v3439_v14 = vunpack.i.l.bf16 %v3438_v10 }
0x117e   :  { %v3435_v15 = vunpack.i.h.bf16 %v3433_v12  ;;  %v3434_v16 = vunpack.i.l.bf16 %v3433_v12 }
0x117f   :  { %v3309_v23 = vpack.c.bf16 %v3440_v13, %v3439_v14 }
0x1180   :  { %v3305_v32 = vpack.c.bf16 %v3435_v15, %v3434_v16  ;;  %v3443_v18 = vpop.permute.xlu1 %3442 }
0x1181   :  { %v3445_v19 = vunpack.i.h.bf16 %v3443_v18  ;;  %v3444_v20 = vunpack.i.l.bf16 %v3443_v18  ;;  %v1920_v22 = vpop.permute.xlu0 %1919 }
0x1182   :  { %3306 = vmatprep.subr.bf16.mxu0 %v3305_v32 }
0x1183   :  { %v3517_v17 = vpop.eup %3516  ;;  %v3319_v25 = vpack.c.bf16 %v3445_v19, %v3444_v20  ;;  %3308 = vmatpush3.bf16.msra.mxu0 %v3305_v32 }
0x1184   :  { %v3519_v11 = vpop.eup %3518  ;;  %3311 = vmatprep.subr.msk.bf16.mxu0 %vm3620_vm2, %v3309_v23  ;;  %v1827_v28 = vmul.f32 %v3517_v17, %v3513_v4  ;;  %v1922_v29 = vpop.permute.xlu1 %1921 }
0x1185   :  { %v2122_v26 = vpop.permute.xlu0 %2121  ;;  %3321 = vmatprep.subr.msk.bf16.mxu1 %vm3620_vm2, %v3319_v25  ;;  %v1826_v27 = vmul.f32 %v3519_v11, %v3515_v6  ;;  %v2806_v11 = vld [vmem:[%s4050_s0 + $0x178] ss:$0 sm:$0xff] }
0x1186   :  { %3324 = vmatpush3.bf16.xpose.msk.msra.mxu1 %vm3620_vm2, %v3319_v25  ;;  %3142 = vmatprep.mubr.msk.f32.mxu1 %vm199_vm1, %v2122_v26  ;;  %v1714_v26 = vadd.f32 %v3872_v7, %v2806_v11 }
0x1187   :  { %3121 = vmatprep.mubr.msk.f32.mxu0 %vm285_vm3, %v1826_v27  ;;  %v1713_v27 = vadd.f32 %v2806_v11, %v3874_v5 }
0x1188   :  { %3122 = vmatmul.mubr.msk.f32.vlgmr.msra.gmra.mrb[14].mxu0 %vm285_vm3, %v1827_v28  ;;  %v2124_v30 = vpop.permute.xlu1 %2123 }
0x1189   :  { %3128 = vmatprep.mubr.msk.f32.mxu0 %vm199_vm1, %v1920_v22 }
0x118c   :  { %3314 = vmatpush3.bf16.xpose.msk.msra.mxu0 %vm3620_vm2, %v3309_v23 }
0x118d   :  { %3143 = vmatmul.mubr.msk.f32.vlgmr.msra.gmra.mrb[14].mxu1 %vm199_vm1, %v2124_v30 }
0x1193   :  { %3129 = vmatmul.mubr.msk.f32.vlgmr.msra.gmra.mrb[16].mxu0 %vm199_vm1, %v1922_v29 }
0x1260   :  { %v3144_v31 = vpop.f32.mrb[14].mxu1 }
0x1261   :  { %v2203_v35 = vpop.f32.mrb[15].mxu1  ;;  %v2209_v44 = vadd.f32 %v3552_v37, %v3144_v31 }
0x1262   :  { %v2204_v42 = vadd.f32 %v3553_v40, %v2203_v35 }
0x1263   :  { %v2215_v46 = vsel %vm285_vm3, %v2209_v44, -inf }
0x1264   :  { %v2212_v45 = vsel %vm285_vm3, %v2204_v42, -inf }
0x1266   :  { %v3130_v36 = vpop.f32.mrb[16].mxu0 }
0x1267   :  { %v2007_v38 = vadd.f32 %v3552_v37, %v3130_v36  ;;  %v2001_v39 = vpop.f32.mrb[17].mxu0 }
0x1268   :  { %v2002_v41 = vadd.f32 %v3553_v40, %v2001_v39 }
0x1269   :  { %v2013_v24 = vsel %vm285_vm3, %v2007_v38, -inf }
0x126a   :  { %2014 = vmax.xlane.f32.xlu1 %v2013_v24  ;;  %v2010_v43 = vsel %vm285_vm3, %v2002_v41, -inf }
0x126b   :  { %2011 = vmax.xlane.f32.xlu0 %v2010_v43 }
0x126f   :  { %2213 = vmax.xlane.f32.xlu0 %v2212_v45 }
0x1273   :  { %2216 = vmax.xlane.f32.xlu0 %v2215_v46 }
0x12f7   :  { %v2015_v49 = vpop.xlane.xlu1 %2014 }
0x12f8   :  { %v2012_v47 = vpop.xlane.xlu0 %2011  ;;  %v2017_v52 = vsub.f32 %v2007_v38, %v2015_v49 }
0x12f9   :  { %v2016_v48 = vsub.f32 %v2002_v41, %v2012_v47 }
0x12fa   :  { %v2020_v57 = vmul.f32 1.442695, %v2017_v52 }
0x12fb   :  { %v2018_v53 = vmul.f32 1.442695, %v2016_v48 }
0x12fc   :  { %v2214_v50 = vpop.xlane.xlu0 %2213 }
0x12fd   :  { %v2218_v51 = vsub.f32 %v2204_v42, %v2214_v50 }
0x12ff   :  { %v2220_v54 = vmul.f32 1.442695, %v2218_v51  ;;  %v2825_v51 = vld [vmem:[%s4050_s0 + $0x1f0] ss:$0 sm:$0xff] }
0x1300   :  { %v2217_v55 = vpop.xlane.xlu0 %2216 }
0x1301   :  { %3520 = vpow2.f32 %v2220_v54  ;;  %v2219_v56 = vsub.f32 %v2209_v44, %v2217_v55  ;;  %v2826_v54 = vld [vmem:[%s4050_s0 + $0x1f8] ss:$0 sm:$0xff] }
0x1302   :  { %3522 = vpow2.f32 %v2018_v53 }
0x1303   :  { %v2222_v58 = vmul.f32 1.442695, %v2219_v56 }
0x1305   :  { %3524 = vpow2.f32 %v2222_v58 }
0x1306   :  { %3526 = vpow2.f32 %v2020_v57  ;;  %v2366_v57 = vld [vmem:[%s4050_s0 + $0x228] sm:$0xff] }
0x130b   :  { %v3521_v61 = vpop.eup %3520 }
0x130c   :  { %v2224_v62 = vsel %vm285_vm3, %v3521_v61, 0.0  ;;  %v3523_v63 = vpop.eup %3522 }
0x130d   :  { %2225 = vadd.xlane.f32.xlu1 %v2224_v62  ;;  %v2022_v1 = vsel %vm285_vm3, %v3523_v63, 0.0  ;;  %v2365_v62 = vld [vmem:[%s4050_s0 + $0x220] sm:$0xff] }
0x130f   :  { %v3525_v0 = vpop.eup %3524 }
0x1310   :  { %v2227_v2 = vsel %vm285_vm3, %v3525_v0, 0.0  ;;  %v3527_v3 = vpop.eup %3526 }
0x1311   :  { %2023 = vadd.xlane.f32.xlu1 %v2022_v1  ;;  %2228 = vadd.xlane.f32.xlu0 %v2227_v2  ;;  %v2025_v4 = vsel %vm285_vm3, %v3527_v3, 0.0 }
0x1315   :  { %2026 = vadd.xlane.f32.xlu0 %v2025_v4 }
0x1322   :  { %3447 = vrot.lane.b32.xlu1 %v3850_v21, %s3554_s28 }
0x132b   :  { %3452 = vrot.lane.b32.xlu0 %v3850_v21, %s3562_s11 }
0x139a   :  { %v2226_v6 = vpop.xlane.xlu1 %2225 }
0x139e   :  { %v2024_v33 = vpop.xlane.xlu1 %2023  ;;  %v2229_v34 = vpop.xlane.xlu0 %2228 }
0x139f   :  { %3528 = vrcp.f32 %v2024_v33 }
0x13a0   :  { %3530 = vrcp.f32 %v2226_v6 }
0x13a2   :  { %v3448_v8 = vpop.permute.xlu1 %3447  ;;  %v2027_v9 = vpop.xlane.xlu0 %2026 }
0x13a3   :  { %v3450_v10 = vunpack.i.h.bf16 %v3448_v8  ;;  %v3449_v12 = vunpack.i.l.bf16 %v3448_v8  ;;  %3532 = vrcp.f32 %v2027_v9 }
0x13a4   :  { %3534 = vrcp.f32 %v2229_v34 }
0x13a5   :  { %v3315_v13 = vpack.c.bf16 %v3450_v10, %v3449_v12 }
0x13a6   :  { %v3453_v14 = vpop.permute.xlu0 %3452 }
0x13a7   :  { %v3455_v15 = vunpack.i.h.bf16 %v3453_v14  ;;  %v3454_v16 = vunpack.i.l.bf16 %v3453_v14  ;;  %3316 = vmatprep.subr.bf16.mxu0 %v3315_v13 }
0x13a8   :  { %3318 = vmatpush3.bf16.msra.mxu0 %v3315_v13 }
0x13a9   :  { %v3529_v32 = vpop.eup %3528  ;;  %v3325_v18 = vpack.c.bf16 %v3455_v15, %v3454_v16  ;;  %v2409_v15 = vld [vmem:[%s4050_s0 + $0x180] sm:$0xff]  ;;  %v2410_v16 = vld [vmem:[%s4050_s0 + $0x188] sm:$0xff] }
0x13aa   :  { %v2030_v21 = vmul.f32 %v3529_v32, %v3523_v63  ;;  %v3531_v19 = vpop.eup %3530  ;;  %v3329_v32 = vpack.c.bf16 %v2410_v16, %v2409_v15 }
0x13ab   :  { %3326 = vmatprep.subr.bf16.mxu0 %v3325_v18  ;;  %v2232_v23 = vmul.f32 %v3531_v19, %v3521_v61 }
0x13ac   :  { %3135 = vmatprep.mubr.msk.f32.mxu0 %vm285_vm3, %v2030_v21  ;;  %v2412_v21 = vld [vmem:[%s4050_s0 + $0x198] sm:$0xff]  ;;  %3330 = vmatprep.subr.bf16.mxu1 %v3329_v32 }
0x13ad   :  { %v3533_v20 = vpop.eup %3532  ;;  %3332 = vmatpush3.bf16.msra.mxu1 %v3329_v32 }
0x13ae   :  { %v2031_v22 = vmul.f32 %v3533_v20, %v3527_v3  ;;  %v3535_v17 = vpop.eup %3534 }
0x13af   :  { %v2233_v25 = vmul.f32 %v3535_v17, %v3525_v0 }
0x13b0   :  { %3136 = vmatmul.mubr.msk.f32.vlgmr.msra.gmra.mrb[14].mxu0 %vm285_vm3, %v2031_v22 }
0x13b1   :  { %3328 = vmatpush3.bf16.msra.mxu0 %v3325_v18  ;;  %3149 = vmatprep.mubr.msk.f32.mxu0 %vm285_vm3, %v2232_v23  ;;  %v2411_v18 = vld [vmem:[%s4050_s0 + $0x190] sm:$0xff] }
0x13b2   :  { %v3333_v19 = vpack.c.bf16 %v2412_v21, %v2411_v18 }
0x13b4   :  { %3334 = vmatprep.subr.bf16.mxu1 %v3333_v19 }
0x13b5   :  { %3336 = vmatpush3.bf16.msra.mxu1 %v3333_v19 }
0x13b8   :  { %3150 = vmatmul.mubr.msk.f32.vlgmr.msra.gmra.mrb[14].mxu0 %vm285_vm3, %v2233_v25 }
0x148b   :  { %v3151_v28 = vpop.f32.mrb[14].mxu0 }
0x148c   :  { %v3364_v29 = vadd.f32 %v3151_v28, %v1714_v26  ;;  %v2312_v30 = vpop.f32.mrb[15].mxu0 }
0x148d   :  { %v3366_v31 = vadd.f32 %v2312_v30, %v1713_v27  ;;  %v2827_v27 = vld [vmem:[%s4050_s0 + $0x200] ss:$0 sm:$0xff] }
0x148e   :  { %v2324_v35 = vadd.f32 %v3364_v29, %v3809_v60 }
0x148f   :  { %v2323_v36 = vadd.f32 %v3366_v31, %v3807_v59  ;;  %v2828_v31 = vld [vmem:[%s4050_s0 + $0x208] ss:$0 sm:$0xff] }
0x1490   :  { %v2330_v37 = vsel %vm21_vm0, %v2324_v35, 0.0 }
0x1491   :  { %2331 = vadd.xlane.f32.xlu0 %v2330_v37  ;;  %v2327_v38 = vsel %vm21_vm0, %v2323_v36, 0.0 }
0x1492   :  { %2328 = vadd.xlane.f32.xlu1 %v2327_v38 }
0x151e   :  { %v2332_v39 = vpop.xlane.xlu0 %2331 }
0x151f   :  { %v2334_v40 = vmul.f32 0.03125, %v2332_v39  ;;  %v2329_v41 = vpop.xlane.xlu1 %2328  ;;  %v2517_v39 = vld [vmem:[%s4050_s0 + $0x1a8] sm:$0xff] }
0x1520   :  { %v2333_v7 = vmul.f32 0.03125, %v2329_v41 }
0x1521   :  { %v2336_v24 = vsub.f32 %v2324_v35, %v2334_v40  ;;  %v2518_v40 = vld [vmem:[%s4050_s0 + $0x1b0] sm:$0xff] }
0x1522   :  { %v2335_v5 = vsub.f32 %v2323_v36, %v2333_v7  ;;  %v3337_v41 = vpack.c.bf16 %v2518_v40, %v2517_v39  ;;  %v2519_v7 = vld [vmem:[%s4050_s0 + $0x1b8] sm:$0xff] }
0x1523   :  { %v2338_v42 = vmul.f32 %v2336_v24, %v2336_v24 }
0x1524   :  { %v2337_v43 = vmul.f32 %v2335_v5, %v2335_v5  ;;  %3338 = vmatprep.subr.bf16.mxu0 %v3337_v41 }
0x1525   :  { %v2342_v44 = vsel %vm21_vm0, %v2338_v42, 0.0  ;;  %v2521_v42 = vld [vmem:[%s4050_s0 + $0x1c8] sm:$0xff]  ;;  %3340 = vmatpush3.bf16.msra.mxu0 %v3337_v41 }
0x1526   :  { %2343 = vadd.xlane.f32.xlu0 %v2342_v44  ;;  %v2339_v60 = vsel %vm21_vm0, %v2337_v43, 0.0  ;;  %v2522_v43 = vld [vmem:[%s4050_s0 + $0x1d0] sm:$0xff] }
0x1527   :  { %2340 = vadd.xlane.f32.xlu1 %v2339_v60  ;;  %v3345_v44 = vpack.c.bf16 %v2522_v43, %v2521_v42  ;;  %v2523_v60 = vld [vmem:[%s4050_s0 + $0x1d8] sm:$0xff] }
0x1528   :  { %v2836_v43 = vld [vmem:[%s4050_s0 + $0x218] ss:$0 sm:$0xff] }
0x15b3   :  { %v2344_v59 = vpop.xlane.xlu0 %2343 }
0x15b4   :  { %v2346_v45 = vmul.f32 0.03125, %v2344_v59  ;;  %v2341_v46 = vpop.xlane.xlu1 %2340  ;;  %v2524_v59 = vld [vmem:[%s4050_s0 + $0x1e0] sm:$0xff] }
0x15b5   :  { %v2345_v47 = vmul.f32 0.03125, %v2341_v46  ;;  %v2829_v46 = vld [vmem:[%s4050_s0 + $0x1a0] ss:$0 sm:$0xff] }
0x15b6   :  { %v2348_v48 = vadd.f32 1e-05, %v2346_v45  ;;  %v3349_v45 = vpack.c.bf16 %v2524_v59, %v2523_v60 }
0x15b7   :  { %v2347_v49 = vadd.f32 1e-05, %v2345_v47 }
0x15b8   :  { %3536 = vrsqrt.f32 %v2348_v48 }
0x15b9   :  { %3538 = vrsqrt.f32 %v2347_v49 }
0x15c2   :  { %v3537_v50 = vpop.eup %3536 }
0x15c3   :  { %v3539_v52 = vpop.eup %3538  ;;  %v2352_v53 = vmul.f32 %v3537_v50, %v2336_v24  ;;  %v2520_v24 = vld [vmem:[%s4050_s0 + $0x1c0] sm:$0xff] }
0x15c4   :  { %v2351_v55 = vmul.f32 %v3539_v52, %v2335_v5  ;;  %v3341_v5 = vpack.c.bf16 %v2520_v24, %v2519_v7  ;;  %v2835_v7 = vld [vmem:[%s4050_s0 + $0x210] ss:$0 sm:$0xff] }
0x15c5   :  { %v2358_v56 = vmul.f32 %v2825_v51, %v2352_v53 }
0x15c6   :  { %v2357_v58 = vmul.f32 %v2825_v51, %v2351_v55  ;;  %3342 = vmatprep.subr.bf16.mxu0 %v3341_v5 }
0x15c7   :  { %v2364_v61 = vadd.f32 %v2826_v54, %v2358_v56  ;;  %3344 = vmatpush3.bf16.msra.mxu0 %v3341_v5 }
0x15c8   :  { %v2363_v63 = vadd.f32 %v2826_v54, %v2357_v58  ;;  %3346 = vmatprep.subr.bf16.mxu0 %v3345_v44 }
0x15c9   :  { %v2368_v0 = vadd.f32 %v2366_v57, %v2364_v61 }
0x15ca   :  { %v2367_v1 = vadd.f32 %v2365_v62, %v2363_v63 }
0x15cb   :  { %v2374_v2 = vsel %vm21_vm0, %v2368_v0, 0.0  ;;  %3348 = vmatpush3.bf16.msra.mxu0 %v3345_v44 }
0x15cc   :  { %2375 = vadd.xlane.f32.xlu0 %v2374_v2  ;;  %v2371_v3 = vsel %vm21_vm0, %v2367_v1, 0.0  ;;  %3350 = vmatprep.subr.bf16.mxu0 %v3349_v45 }
0x15cd   :  { %2372 = vadd.xlane.f32.xlu1 %v2371_v3 }
0x15cf   :  { %3352 = vmatpush3.bf16.msra.mxu0 %v3349_v45 }
0x1659   :  { %v2376_v4 = vpop.xlane.xlu0 %2375 }
0x165a   :  { %v2378_v6 = vmul.f32 0.03125, %v2376_v4  ;;  %v2373_v33 = vpop.xlane.xlu1 %2372 }
0x165b   :  { %v2377_v34 = vmul.f32 0.03125, %v2373_v33 }
0x165c   :  { %v2380_v8 = vsub.f32 %v2368_v0, %v2378_v6 }
0x165d   :  { %v2379_v9 = vsub.f32 %v2367_v1, %v2377_v34  ;;  %v2832_v34 = vld [vmem:[%s4050_s0 + $0x1e8] ss:$0 sm:$0xff] }
0x165e   :  { %v2382_v10 = vmul.f32 %v2380_v8, %v2380_v8 }
0x165f   :  { %v2381_v12 = vmul.f32 %v2379_v9, %v2379_v9 }
0x1660   :  { %v2386_v13 = vsel %vm21_vm0, %v2382_v10, 0.0 }
0x1661   :  { %2387 = vadd.xlane.f32.xlu0 %v2386_v13  ;;  %v2383_v14 = vsel %vm21_vm0, %v2381_v12, 0.0 }
0x1662   :  { %2384 = vadd.xlane.f32.xlu1 %v2383_v14 }
0x16ee   :  { %v2388_v20 = vpop.xlane.xlu0 %2387 }
0x16ef   :  { %v2390_v22 = vmul.f32 0.03125, %v2388_v20  ;;  %v2385_v23 = vpop.xlane.xlu1 %2384 }
0x16f0   :  { %v2389_v17 = vmul.f32 0.03125, %v2385_v23 }
0x16f1   :  { %v2392_v25 = vadd.f32 1e-05, %v2390_v22 }
0x16f2   :  { %v2391_v11 = vadd.f32 1e-05, %v2389_v17 }
0x16f3   :  { %3540 = vrsqrt.f32 %v2392_v25 }
0x16f4   :  { %3542 = vrsqrt.f32 %v2391_v11 }
0x16fd   :  { %v3541_v26 = vpop.eup %3540 }
0x16fe   :  { %v3543_v28 = vpop.eup %3542  ;;  %v2396_v29 = vmul.f32 %v3541_v26, %v2380_v8  ;;  %v2653_v26 = vld [vmem:[%s4050_s0 + $0x230] sm:$0xff] }
0x16ff   :  { %v2395_v30 = vmul.f32 %v3543_v28, %v2379_v9 }
0x1700   :  { %v2402_v35 = vmul.f32 %v2827_v27, %v2396_v29  ;;  %v2655_v29 = vld [vmem:[%s4050_s0 + $0x240] sm:$0xff] }
0x1701   :  { %v2401_v36 = vmul.f32 %v2827_v27, %v2395_v30  ;;  %v2654_v27 = vld [vmem:[%s4050_s0 + $0x238] sm:$0xff]  ;;  %v2656_v30 = vld [vmem:[%s4050_s0 + $0x248] sm:$0xff] }
0x1702   :  { %v2408_v38 = vadd.f32 %v2828_v31, %v2402_v35  ;;  %v3353_v28 = vpack.c.bf16 %v2654_v27, %v2653_v26 }
0x1703   :  { %v2407_v37 = vadd.f32 %v2828_v31, %v2401_v36  ;;  %v3357_v31 = vpack.c.bf16 %v2656_v30, %v2655_v29 }
0x1704   :  { %3354 = vmatprep.subr.bf16.mxu1 %v3353_v28 }
0x1705   :  { %3160 = vmatprep.mubr.msk.f32.mxu1 %vm21_vm0, %v2407_v37 }
0x1706   :  { %3161 = vmatmul.mubr.msk.f32.vlgmr.msra.gmra.mrb[16].mxu1 %vm21_vm0, %v2408_v38 }
0x1707   :  { %3356 = vmatpush3.bf16.msra.mxu1 %v3353_v28 }
0x1708   :  { %3358 = vmatprep.subr.bf16.mxu1 %v3357_v31 }
0x170b   :  { %3360 = vmatpush3.bf16.msra.mxu1 %v3357_v31 }
0x17d9   :  { %v3162_v47 = vpop.f32.mrb[16].mxu1 }
0x17da   :  { %v2496_v48 = vadd.f32 %v3162_v47, %v2829_v46  ;;  %v2490_v49 = vpop.f32.mrb[17].mxu1 }
0x17db   :  { %v2491_v50 = vadd.f32 %v2829_v46, %v2490_v49  ;;  %v2837_v46 = vld [vmem:[%s4050_s0 + $0x250] ss:$0 sm:$0xff] }
0x17dc   :  { %v2502_v51 = vmul.f32 0.044715, %v2496_v48  ;;  %v2500_v4 = vmul.f32 0.5, %v2496_v48 }
0x17dd   :  { %v2501_v52 = vmul.f32 0.044715, %v2491_v50  ;;  %v2499_v2 = vmul.f32 0.5, %v2491_v50 }
0x17de   :  { %v2504_v53 = vmul.f32 %v2502_v51, %v2496_v48  ;;  %v2743_v51 = vld [vmem:[%s4050_s0 + $0x20] sm:$0xff] }
0x17df   :  { %v2503_v54 = vmul.f32 %v2501_v52, %v2491_v50 }
0x17e0   :  { %v2506_v55 = vmul.f32 %v2504_v53, %v2496_v48 }
0x17e1   :  { %v2505_v56 = vmul.f32 %v2503_v54, %v2491_v50 }
0x17e2   :  { %v2508_v57 = vadd.f32 %v2506_v55, %v2496_v48  ;;  %v2744_v48 = vld [vmem:[%s4050_s0 + $0x28] sm:$0xff] }
0x17e3   :  { %v2507_v58 = vadd.f32 %v2505_v56, %v2491_v50 }
0x17e4   :  { %v2510_v61 = vmul.f32 0.7978846, %v2508_v57 }
0x17e5   :  { %v2509_v62 = vmul.f32 0.7978846, %v2507_v58 }
0x17e6   :  { %3544 = vtanh.f32 %v2510_v61 }
0x17e7   :  { %3546 = vtanh.f32 %v2509_v62 }
0x17f0   :  { %v3545_v63 = vpop.eup %3544 }
0x17f1   :  { %v3547_v0 = vpop.eup %3546  ;;  %v2514_v1 = vadd.f32 1.0, %v3545_v63 }
0x17f2   :  { %v2513_v3 = vadd.f32 1.0, %v3547_v0 }
0x17f3   :  { %v2516_v33 = vmul.f32 %v2514_v1, %v2500_v4 }
0x17f4   :  { %v2515_v6 = vmul.f32 %v2513_v3, %v2499_v2 }
0x17f6   :  { %3179 = vmatprep.mubr.msk.f32.mxu0 %vm1211_vm4, %v2515_v6 }
0x17f7   :  { %3180 = vmatmul.mubr.msk.f32.vlgmr.msra.gmra.mrb[18].mxu0 %vm1211_vm4, %v2516_v33 }
0x18ca   :  { %v3181_v8 = vpop.f32.mrb[18].mxu0 }
0x18cb   :  { %v2608_v9 = vadd.f32 %v3181_v8, %v2832_v34  ;;  %v2602_v10 = vpop.f32.mrb[19].mxu0 }
0x18cc   :  { %v2603_v12 = vadd.f32 %v2832_v34, %v2602_v10 }
0x18cd   :  { %v2612_v13 = vadd.f32 %v2608_v9, %v2408_v38 }
0x18ce   :  { %v2611_v14 = vadd.f32 %v2603_v12, %v2407_v37 }
0x18cf   :  { %v2618_v15 = vsel %vm21_vm0, %v2612_v13, 0.0 }
0x18d0   :  { %2619 = vadd.xlane.f32.xlu0 %v2618_v15  ;;  %v2615_v16 = vsel %vm21_vm0, %v2611_v14, 0.0 }
0x18d1   :  { %2616 = vadd.xlane.f32.xlu1 %v2615_v16 }
0x195d   :  { %v2620_v32 = vpop.xlane.xlu0 %2619 }
0x195e   :  { %v2622_v18 = vmul.f32 0.03125, %v2620_v32  ;;  %v2617_v21 = vpop.xlane.xlu1 %2616 }
0x195f   :  { %v2621_v19 = vmul.f32 0.03125, %v2617_v21 }
0x1960   :  { %v2624_v20 = vsub.f32 %v2612_v13, %v2622_v18 }
0x1961   :  { %v2623_v22 = vsub.f32 %v2611_v14, %v2621_v19 }
0x1962   :  { %v2626_v23 = vmul.f32 %v2624_v20, %v2624_v20 }
0x1963   :  { %v2625_v17 = vmul.f32 %v2623_v22, %v2623_v22 }
0x1964   :  { %v2630_v25 = vsel %vm21_vm0, %v2626_v23, 0.0 }
0x1965   :  { %2631 = vadd.xlane.f32.xlu0 %v2630_v25  ;;  %v2627_v11 = vsel %vm21_vm0, %v2625_v17, 0.0 }
0x1966   :  { %2628 = vadd.xlane.f32.xlu1 %v2627_v11 }
0x19f2   :  { %v2632_v35 = vpop.xlane.xlu0 %2631 }
0x19f3   :  { %v2634_v36 = vmul.f32 0.03125, %v2632_v35  ;;  %v2629_v37 = vpop.xlane.xlu1 %2628 }
0x19f4   :  { %v2633_v38 = vmul.f32 0.03125, %v2629_v37 }
0x19f5   :  { %v2636_v39 = vadd.f32 1e-05, %v2634_v36 }
0x19f6   :  { %v2635_v40 = vadd.f32 1e-05, %v2633_v38 }
0x19f7   :  { %3548 = vrsqrt.f32 %v2636_v39 }
0x19f8   :  { %3550 = vrsqrt.f32 %v2635_v40 }
0x1a01   :  { %v3549_v41 = vpop.eup %3548 }
0x1a02   :  { %v3551_v24 = vpop.eup %3550  ;;  %v2640_v5 = vmul.f32 %v3549_v41, %v2624_v20 }
0x1a03   :  { %v2639_v42 = vmul.f32 %v3551_v24, %v2623_v22 }
0x1a04   :  { %v2646_v44 = vmul.f32 %v2835_v7, %v2640_v5 }
0x1a05   :  { %v2645_v60 = vmul.f32 %v2835_v7, %v2639_v42 }
0x1a06   :  { %v2652_v45 = vadd.f32 %v2836_v43, %v2646_v44 }
0x1a07   :  { %v2651_v59 = vadd.f32 %v2836_v43, %v2645_v60 }
0x1a09   :  { %3190 = vmatprep.mubr.msk.f32.mxu1 %vm21_vm0, %v2651_v59 }
0x1a0a   :  { %3191 = vmatmul.mubr.msk.f32.vlgmr.msra.gmra.mrb[18].mxu1 %vm21_vm0, %v2652_v45 }
0x1add   :  { %v3192_v47 = vpop.f32.mrb[18].mxu1 }
0x1ade   :  { %v2740_v49 = vadd.f32 %v3192_v47, %v2837_v46  ;;  %v2734_v50 = vpop.f32.mrb[19].mxu1 }
0x1adf   :  { %v2735_v52 = vadd.f32 %v2837_v46, %v2734_v50 }
0x1ae0   :  { %v2746_v53 = vmul.f32 %v2744_v48, %v2740_v49 }
0x1ae1   :  { %v2745_v54 = vmul.f32 %v2743_v51, %v2735_v52 }
0x1ae2   :  { %2748 = vst [vmem:[%s4051_s1 + $0x8] sm:$0xff] %v2746_v53 }
0x1ae3   :  { %2747 = vst [vmem:[%s4051_s1] sm:$0xff] %v2745_v54 }

</bundles_post_ra>
